<compile_context>
chip_gen: v5e
topology: v5e:2x2
jax: 0.10.0
libtpu: 0.0.40
codegen_flags: <defaults>
</compile_context>

<pallas_src>
import jax
import jax.numpy as jnp
import numpy as np
from jax.experimental import pallas as pl
from jax.experimental.pallas import tpu as pltpu


# ----------------------------------------------------------------------------
# Fused decoder-step kernel (one invocation = one decode step, all layers)
# ----------------------------------------------------------------------------
def _decoder_kernel(tok_ref,      # VMEM (N, 1)       int32
                    emb_ref,      # VMEM (V, H)       bf16   (resident table)
                    h_in_ref,     # VMEM (L, N, H)    f32
                    c_in_ref,     # VMEM (L, N, H)    f32
                    w_ref,        # VMEM (L, 2H, 4H)  bf16   ([W_ih^T; W_hh^T])
                    b_ref,        # VMEM (L, 1, 4H)   f32    (b_ih + b_hh)
                    fcw_ref,      # VMEM (H, O)       bf16
                    fcb_ref,      # VMEM (1, O)       f32
                    preds_ref,    # VMEM (N, O)       f32    out
                    h_out_ref,    # VMEM (L, N, H)    f32    out
                    c_out_ref):   # VMEM (L, N, H)    f32    out
    num_layers, n, hdim = h_in_ref.shape
    vocab = emb_ref.shape[0]

    # ---- embedding gather: one-hot(tokens) @ table on the MXU (exact gather,
    #      table stays VMEM-resident, no per-row DMAs on the critical path).
    tok = tok_ref[...]                                           # (N, 1) int32
    col = jax.lax.broadcasted_iota(jnp.int32, (n, vocab), 1)     # (N, V)
    onehot = jnp.where(col == tok, 1.0, 0.0).astype(jnp.bfloat16)
    x = jnp.dot(onehot, emb_ref[...],
                preferred_element_type=jnp.float32).astype(jnp.bfloat16)  # (N, H)

    # TODO(synk): nn.Dropout (embedding + inter-layer LSTM dropout) is identity
    # in eval mode; training-time masking is not implemented.

    for layer in range(num_layers):                  # static unroll (L is small)
        h_prev = h_in_ref[layer]                     # (N, H) f32
        c_prev = c_in_ref[layer]                     # (N, H) f32

        # Split gate matmul (no lane-axis concat): x @ W_ih^T + h @ W_hh^T + b.
        w_ih = w_ref[layer, pl.ds(0, hdim), :]       # (H, 4H) bf16
        w_hh = w_ref[layer, pl.ds(hdim, hdim), :]    # (H, 4H) bf16
        gates = (jnp.dot(x, w_ih, preferred_element_type=jnp.float32)
                 + jnp.dot(h_prev.astype(jnp.bfloat16), w_hh,
                           preferred_element_type=jnp.float32)
                 + b_ref[layer])                     # (N, 4H) f32

        i_g = jax.nn.sigmoid(gates[:, 0 * hdim:1 * hdim])
        f_g = jax.nn.sigmoid(gates[:, 1 * hdim:2 * hdim])
        g_g = jnp.tanh(gates[:, 2 * hdim:3 * hdim])
        o_g = jax.nn.sigmoid(gates[:, 3 * hdim:4 * hdim])

        c_new = f_g * c_prev + i_g * g_g             # f32 state update
        h_new = o_g * jnp.tanh(c_new)
        h_bf16 = h_new.astype(jnp.bfloat16)          # hoisted: reused twice

        h_out_ref[layer] = h_new
        c_out_ref[layer] = c_new
        x = h_bf16                                   # next layer's input

    # fc projection of the last layer's hidden (the single-time-step output).
    preds_ref[...] = (jnp.dot(x, fcw_ref[...], preferred_element_type=jnp.float32)
                      + fcb_ref[...])


# ----------------------------------------------------------------------------
# Decoder forward: a single pallas_call
# ----------------------------------------------------------------------------
def decoder_forward(params, x, hidden, cell):
    """
    x:      (N,)      int32 token ids
    hidden: (L, N, H) float32
    cell:   (L, N, H) float32
    returns (predictions (N, output_size), hidden (L,N,H), cell (L,N,H))
    """
    num_layers, n, hdim = hidden.shape
    vocab = params["embedding"].shape[0]
    out_dim = params["fc_w_t"].shape[1]
    tok2d = x.reshape(n, 1).astype(jnp.int32)

    fused = pl.pallas_call(
        _decoder_kernel,
        grid=(1,),
        in_specs=[
            pl.BlockSpec((n, 1), lambda i: (0, 0)),                            # tokens
            pl.BlockSpec((vocab, hdim), lambda i: (0, 0)),                     # embedding (VMEM)
            pl.BlockSpec((num_layers, n, hdim), lambda i: (0, 0, 0)),          # hidden
            pl.BlockSpec((num_layers, n, hdim), lambda i: (0, 0, 0)),          # cell
            pl.BlockSpec((num_layers, 2 * hdim, 4 * hdim), lambda i: (0, 0, 0)),  # LSTM W
            pl.BlockSpec((num_layers, 1, 4 * hdim), lambda i: (0, 0, 0)),      # fused bias
            pl.BlockSpec((hdim, out_dim), lambda i: (0, 0)),                   # fc W
            pl.BlockSpec((1, out_dim), lambda i: (0, 0)),                      # fc b
        ],
        out_specs=(
            pl.BlockSpec((n, out_dim), lambda i: (0, 0)),                      # predictions
            pl.BlockSpec((num_layers, n, hdim), lambda i: (0, 0, 0)),          # new hidden
            pl.BlockSpec((num_layers, n, hdim), lambda i: (0, 0, 0)),          # new cell
        ),
        out_shape=(
            jax.ShapeDtypeStruct((n, out_dim), jnp.float32),
            jax.ShapeDtypeStruct((num_layers, n, hdim), jnp.float32),
            jax.ShapeDtypeStruct((num_layers, n, hdim), jnp.float32),
        ),
        # Donate hidden/cell HBM buffers to the new hidden/cell outputs
        # (inputs 2,3 -> outputs 1,2) for autoregressive decode loops.
        input_output_aliases={2: 1, 3: 2},
        compiler_params=pltpu.CompilerParams(
            dimension_semantics=("arbitrary",),
        ),
    )
    preds, new_h, new_c = fused(
        tok2d,
        params["embedding"],
        hidden, cell,
        params["w_lstm"], params["b_lstm"],
        params["fc_w_t"], params["fc_b"])
    return preds, new_h, new_c


# ----------------------------------------------------------------------------
# Pure-JAX reference (same bf16 operand precision) for validation
# ----------------------------------------------------------------------------
def decoder_reference(params, x, hidden, cell):
    hdim = hidden.shape[2]
    layer_in = jnp.take(params["embedding"], x, axis=0)          # (N, H) bf16 (padded)
    new_h, new_c = [], []
    for l in range(hidden.shape[0]):
        w = params["w_lstm"][l]
        gates = (jnp.dot(layer_in, w[:hdim], preferred_element_type=jnp.float32)
                 + jnp.dot(hidden[l].astype(jnp.bfloat16), w[hdim:],
                           preferred_element_type=jnp.float32)
                 + params["b_lstm"][l])
        i_g = jax.nn.sigmoid(gates[:, :hdim])
        f_g = jax.nn.sigmoid(gates[:, hdim:2 * hdim])
        g_g = jnp.tanh(gates[:, 2 * hdim:3 * hdim])
        o_g = jax.nn.sigmoid(gates[:, 3 * hdim:])
        c_new = f_g * cell[l] + i_g * g_g
        h_new = o_g * jnp.tanh(c_new)
        new_h.append(h_new)
        new_c.append(c_new)
        layer_in = h_new.astype(jnp.bfloat16)
    preds = (jnp.dot(layer_in, params["fc_w_t"], preferred_element_type=jnp.float32)
             + params["fc_b"])
    return preds, jnp.stack(new_h), jnp.stack(new_c)


# ----------------------------------------------------------------------------
# Deterministic parameter init (pre-fused / pre-transposed / bf16 layouts)
# ----------------------------------------------------------------------------
def init_params(key, input_size, embedding_size, hidden_size, output_size,
                num_layers):
    assert embedding_size <= hidden_size, "kernel pads E up to H"
    keys = jax.random.split(key, 4 + 4 * num_layers)
    k = iter(keys)
    scale = 0.1
    H = hidden_size

    emb = scale * jax.random.normal(next(k), (input_size, embedding_size), jnp.float32)
    emb = jnp.pad(emb, ((0, 0), (0, H - embedding_size)))        # lane-pad to H
    params = {"embedding": emb.astype(jnp.bfloat16)}             # (V, H) bf16

    w_layers, b_layers = [], []
    for layer in range(num_layers):
        in_dim = embedding_size if layer == 0 else H
        w_ih_t = scale * jax.random.normal(next(k), (in_dim, 4 * H), jnp.float32)
        w_hh_t = scale * jax.random.normal(next(k), (H, 4 * H), jnp.float32)
        b_ih = scale * jax.random.normal(next(k), (1, 4 * H), jnp.float32)
        b_hh = scale * jax.random.normal(next(k), (1, 4 * H), jnp.float32)
        w_ih_t = jnp.pad(w_ih_t, ((0, H - in_dim), (0, 0)))      # zero rows for padded x
        w_layers.append(jnp.concatenate([w_ih_t, w_hh_t], axis=0))   # (2H, 4H)
        b_layers.append(b_ih + b_hh)                                 # fused bias
    params["w_lstm"] = jnp.stack(w_layers).astype(jnp.bfloat16)      # (L, 2H, 4H) bf16
    params["b_lstm"] = jnp.stack(b_layers)                           # (L, 1, 4H) f32

    params["fc_w_t"] = (scale * jax.random.normal(
        next(k), (H, output_size), jnp.float32)).astype(jnp.bfloat16)  # (H, O) bf16
    params["fc_b"] = scale * jax.random.normal(next(k), (1, output_size), jnp.float32)
    return params


# ----------------------------------------------------------------------------
# main
# ----------------------------------------------------------------------------
if __name__ == "__main__":
    # Small but lane-dense shapes (H, O multiples of 128; batch padded to 16).
    input_size = 384       # vocab
    embedding_size = 128
    hidden_size = 128
    output_size = 256
    num_layers = 2
    batch = 16

    key = jax.random.PRNGKey(0)
    k_param, k_x, k_h, k_c = jax.random.split(key, 4)

    params = init_params(k_param, input_size, embedding_size, hidden_size,
                         output_size, num_layers)

    x = jax.random.randint(k_x, (batch,), 0, input_size, dtype=jnp.int32)
    hidden = jax.random.normal(k_h, (num_layers, batch, hidden_size), jnp.float32)
    cell = jax.random.normal(k_c, (num_layers, batch, hidden_size), jnp.float32)

    preds, new_hidden, new_cell = jax.jit(decoder_forward)(params, x, hidden, cell)
    jax.block_until_ready((preds, new_hidden, new_cell))

    assert preds.shape == (batch, output_size)
    assert new_hidden.shape == (num_layers, batch, hidden_size)
    assert new_cell.shape == (num_layers, batch, hidden_size)

    # Validate against a pure-JAX reference (same bf16 operand precision).
    preds_r, hid_r, cell_r = decoder_reference(params, x, hidden, cell)
    np.testing.assert_allclose(np.asarray(preds), np.asarray(preds_r),
                               rtol=3e-2, atol=3e-2)
    np.testing.assert_allclose(np.asarray(new_hidden), np.asarray(hid_r),
                               rtol=3e-2, atol=3e-2)
    np.testing.assert_allclose(np.asarray(new_cell), np.asarray(cell_r),
                               rtol=3e-2, atol=3e-2)

    print("KERNEL_OK")
</pallas_src>

<mosaic_0001>
module attributes {stable_mosaic.version = 11 : i64} {
  func.func @_decoder_kernel(%arg0: i32, %arg1: memref<16x1xi32, #tpu.memory_space<vmem>>, %arg2: memref<384x128xbf16, #tpu.memory_space<vmem>>, %arg3: memref<2x16x128xf32, #tpu.memory_space<vmem>>, %arg4: memref<2x16x128xf32, #tpu.memory_space<vmem>>, %arg5: memref<2x256x512xbf16, #tpu.memory_space<vmem>>, %arg6: memref<2x1x512xf32, #tpu.memory_space<vmem>>, %arg7: memref<128x256xbf16, #tpu.memory_space<vmem>>, %arg8: memref<1x256xf32, #tpu.memory_space<vmem>>, %arg9: memref<16x256xf32, #tpu.memory_space<vmem>>, %arg10: memref<2x16x128xf32, #tpu.memory_space<vmem>>, %arg11: memref<2x16x128xf32, #tpu.memory_space<vmem>>) attributes {dimension_semantics = [#tpu.dimension_semantics<arbitrary>], iteration_bounds = array<i64: 1>, scalar_prefetch = 0 : i64, scratch_operands = 0 : i64, tpu.core_type = #tpu.core_type<tc>, window_params = [{pipeline_mode = #tpu.pipeline_mode<synchronous>, transform_indices = @transform_0, window_bounds = array<i64: 16, 1>}, {pipeline_mode = #tpu.pipeline_mode<synchronous>, transform_indices = @transform_1, window_bounds = array<i64: 384, 128>}, {pipeline_mode = #tpu.pipeline_mode<synchronous>, transform_indices = @transform_2, window_bounds = array<i64: 2, 16, 128>}, {pipeline_mode = #tpu.pipeline_mode<synchronous>, transform_indices = @transform_3, window_bounds = array<i64: 2, 16, 128>}, {pipeline_mode = #tpu.pipeline_mode<synchronous>, transform_indices = @transform_4, window_bounds = array<i64: 2, 256, 512>}, {pipeline_mode = #tpu.pipeline_mode<synchronous>, transform_indices = @transform_5, window_bounds = array<i64: 2, 1, 512>}, {pipeline_mode = #tpu.pipeline_mode<synchronous>, transform_indices = @transform_6, window_bounds = array<i64: 128, 256>}, {pipeline_mode = #tpu.pipeline_mode<synchronous>, transform_indices = @transform_7, window_bounds = array<i64: 1, 256>}, {pipeline_mode = #tpu.pipeline_mode<synchronous>, transform_indices = @transform_8, window_bounds = array<i64: 16, 256>}, {pipeline_mode = #tpu.pipeline_mode<synchronous>, transform_indices = @transform_9, window_bounds = array<i64: 2, 16, 128>}, {pipeline_mode = #tpu.pipeline_mode<synchronous>, transform_indices = @transform_10, window_bounds = array<i64: 2, 16, 128>}]} {
    %c0 = arith.constant 0 : index
    %c0_0 = arith.constant 0 : index
    %0 = vector.load %arg1[%c0, %c0_0] : memref<16x1xi32, #tpu.memory_space<vmem>>, vector<16x1xi32>
    %1 = tpu.iota {dimensions = array<i32: 1>} : vector<16x384xi32>
    %2 = vector.broadcast %0 : vector<16x1xi32> to vector<16x384xi32>
    %3 = arith.cmpi eq, %1, %2 : vector<16x384xi32>
    %cst = arith.constant 1.000000e+00 : f32
    %cst_1 = arith.constant 0.000000e+00 : f32
    %4 = vector.broadcast %cst : f32 to vector<16x384xf32>
    %5 = vector.broadcast %cst_1 : f32 to vector<16x384xf32>
    %6 = arith.select %3, %4, %5 : vector<16x384xi1>, vector<16x384xf32>
    %7 = arith.truncf %6 : vector<16x384xf32> to vector<16x384xbf16>
    %c0_2 = arith.constant 0 : index
    %c0_3 = arith.constant 0 : index
    %8 = vector.load %arg2[%c0_2, %c0_3] : memref<384x128xbf16, #tpu.memory_space<vmem>>, vector<384x128xbf16>
    %cst_4 = arith.constant dense<0.000000e+00> : vector<16x128xf32>
    %9 = tpu.matmul %7, %8, %cst_4 {dimension_numbers = #tpu.dot_dimension_numbers<[1], [0], [0], [1], [0, 0, 1, 1], [], []>} : vector<16x384xbf16>, vector<384x128xbf16>, vector<16x128xf32> -> vector<16x128xf32>
    %10 = arith.truncf %9 : vector<16x128xf32> to vector<16x128xbf16>
    %c0_5 = arith.constant 0 : index
    %c0_6 = arith.constant 0 : index
    %c0_7 = arith.constant 0 : index
    %11 = vector.load %arg3[%c0_5, %c0_6, %c0_7] : memref<2x16x128xf32, #tpu.memory_space<vmem>>, vector<1x16x128xf32>
    %12 = vector.shape_cast %11 : vector<1x16x128xf32> to vector<16x128xf32>
    %c0_8 = arith.constant 0 : index
    %c0_9 = arith.constant 0 : index
    %c0_10 = arith.constant 0 : index
    %13 = vector.load %arg4[%c0_8, %c0_9, %c0_10] : memref<2x16x128xf32, #tpu.memory_space<vmem>>, vector<1x16x128xf32>
    %14 = vector.shape_cast %13 : vector<1x16x128xf32> to vector<16x128xf32>
    %c0_11 = arith.constant 0 : index
    %c0_12 = arith.constant 0 : index
    %c0_13 = arith.constant 0 : index
    %15 = vector.load %arg5[%c0_11, %c0_12, %c0_13] : memref<2x256x512xbf16, #tpu.memory_space<vmem>>, vector<1x128x512xbf16>
    %16 = vector.shape_cast %15 : vector<1x128x512xbf16> to vector<128x512xbf16>
    %c0_14 = arith.constant 0 : index
    %c128 = arith.constant 128 : index
    %c0_15 = arith.constant 0 : index
    %17 = vector.load %arg5[%c0_14, %c128, %c0_15] : memref<2x256x512xbf16, #tpu.memory_space<vmem>>, vector<1x128x512xbf16>
    %18 = vector.shape_cast %17 : vector<1x128x512xbf16> to vector<128x512xbf16>
    %cst_16 = arith.constant dense<0.000000e+00> : vector<16x512xf32>
    %19 = tpu.matmul %10, %16, %cst_16 {dimension_numbers = #tpu.dot_dimension_numbers<[1], [0], [0], [1], [0, 0, 1, 1], [], []>} : vector<16x128xbf16>, vector<128x512xbf16>, vector<16x512xf32> -> vector<16x512xf32>
    %20 = arith.truncf %12 : vector<16x128xf32> to vector<16x128xbf16>
    %cst_17 = arith.constant dense<0.000000e+00> : vector<16x512xf32>
    %21 = tpu.matmul %20, %18, %cst_17 {dimension_numbers = #tpu.dot_dimension_numbers<[1], [0], [0], [1], [0, 0, 1, 1], [], []>} : vector<16x128xbf16>, vector<128x512xbf16>, vector<16x512xf32> -> vector<16x512xf32>
    %22 = arith.addf %19, %21 : vector<16x512xf32>
    %c0_18 = arith.constant 0 : index
    %c0_19 = arith.constant 0 : index
    %c0_20 = arith.constant 0 : index
    %23 = vector.load %arg6[%c0_18, %c0_19, %c0_20] : memref<2x1x512xf32, #tpu.memory_space<vmem>>, vector<1x1x512xf32>
    %24 = vector.shape_cast %23 : vector<1x1x512xf32> to vector<1x512xf32>
    %25 = vector.broadcast %24 : vector<1x512xf32> to vector<16x512xf32>
    %26 = arith.addf %22, %25 : vector<16x512xf32>
    %27 = vector.extract_strided_slice %26 {offsets = [0, 0], sizes = [16, 128], strides = [1, 1]} : vector<16x512xf32> to vector<16x128xf32>
    %28 = arith.negf %27 : vector<16x128xf32>
    %29 = math.exp %28 : vector<16x128xf32>
    %cst_21 = arith.constant 1.000000e+00 : f32
    %30 = vector.broadcast %cst_21 : f32 to vector<16x128xf32>
    %31 = arith.addf %30, %29 : vector<16x128xf32>
    %32 = arith.divf %30, %31 : vector<16x128xf32>
    %33 = vector.extract_strided_slice %26 {offsets = [0, 128], sizes = [16, 128], strides = [1, 1]} : vector<16x512xf32> to vector<16x128xf32>
    %34 = arith.negf %33 : vector<16x128xf32>
    %35 = math.exp %34 : vector<16x128xf32>
    %cst_22 = arith.constant 1.000000e+00 : f32
    %36 = vector.broadcast %cst_22 : f32 to vector<16x128xf32>
    %37 = arith.addf %36, %35 : vector<16x128xf32>
    %38 = arith.divf %36, %37 : vector<16x128xf32>
    %39 = vector.extract_strided_slice %26 {offsets = [0, 256], sizes = [16, 128], strides = [1, 1]} : vector<16x512xf32> to vector<16x128xf32>
    %40 = math.tanh %39 : vector<16x128xf32>
    %41 = vector.extract_strided_slice %26 {offsets = [0, 384], sizes = [16, 128], strides = [1, 1]} : vector<16x512xf32> to vector<16x128xf32>
    %42 = arith.negf %41 : vector<16x128xf32>
    %43 = math.exp %42 : vector<16x128xf32>
    %cst_23 = arith.constant 1.000000e+00 : f32
    %44 = vector.broadcast %cst_23 : f32 to vector<16x128xf32>
    %45 = arith.addf %44, %43 : vector<16x128xf32>
    %46 = arith.divf %44, %45 : vector<16x128xf32>
    %47 = arith.mulf %38, %14 : vector<16x128xf32>
    %48 = arith.mulf %32, %40 : vector<16x128xf32>
    %49 = arith.addf %47, %48 : vector<16x128xf32>
    %50 = math.tanh %49 : vector<16x128xf32>
    %51 = arith.mulf %46, %50 : vector<16x128xf32>
    %52 = arith.truncf %51 : vector<16x128xf32> to vector<16x128xbf16>
    %c0_24 = arith.constant 0 : index
    %c0_25 = arith.constant 0 : index
    %c0_26 = arith.constant 0 : index
    %53 = vector.load %arg10[%c0_24, %c0_25, %c0_26] : memref<2x16x128xf32, #tpu.memory_space<vmem>>, vector<1x16x128xf32>
    %54 = vector.shape_cast %53 : vector<1x16x128xf32> to vector<16x128xf32>
    %55 = vector.shape_cast %51 : vector<16x128xf32> to vector<1x16x128xf32>
    tpu.vector_store %arg10[%c0_24, %c0_25, %c0_26], %55 {strides = array<i32>} : memref<2x16x128xf32, #tpu.memory_space<vmem>>, vector<1x16x128xf32>,
    %c0_27 = arith.constant 0 : index
    %c0_28 = arith.constant 0 : index
    %c0_29 = arith.constant 0 : index
    %56 = vector.load %arg11[%c0_27, %c0_28, %c0_29] : memref<2x16x128xf32, #tpu.memory_space<vmem>>, vector<1x16x128xf32>
    %57 = vector.shape_cast %56 : vector<1x16x128xf32> to vector<16x128xf32>
    %58 = vector.shape_cast %49 : vector<16x128xf32> to vector<1x16x128xf32>
    tpu.vector_store %arg11[%c0_27, %c0_28, %c0_29], %58 {strides = array<i32>} : memref<2x16x128xf32, #tpu.memory_space<vmem>>, vector<1x16x128xf32>,
    %c1 = arith.constant 1 : index
    %c0_30 = arith.constant 0 : index
    %c0_31 = arith.constant 0 : index
    %59 = vector.load %arg3[%c1, %c0_30, %c0_31] : memref<2x16x128xf32, #tpu.memory_space<vmem>>, vector<1x16x128xf32>
    %60 = vector.shape_cast %59 : vector<1x16x128xf32> to vector<16x128xf32>
    %c1_32 = arith.constant 1 : index
    %c0_33 = arith.constant 0 : index
    %c0_34 = arith.constant 0 : index
    %61 = vector.load %arg4[%c1_32, %c0_33, %c0_34] : memref<2x16x128xf32, #tpu.memory_space<vmem>>, vector<1x16x128xf32>
    %62 = vector.shape_cast %61 : vector<1x16x128xf32> to vector<16x128xf32>
    %c1_35 = arith.constant 1 : index
    %c0_36 = arith.constant 0 : index
    %c0_37 = arith.constant 0 : index
    %63 = vector.load %arg5[%c1_35, %c0_36, %c0_37] : memref<2x256x512xbf16, #tpu.memory_space<vmem>>, vector<1x128x512xbf16>
    %64 = vector.shape_cast %63 : vector<1x128x512xbf16> to vector<128x512xbf16>
    %c1_38 = arith.constant 1 : index
    %c128_39 = arith.constant 128 : index
    %c0_40 = arith.constant 0 : index
    %65 = vector.load %arg5[%c1_38, %c128_39, %c0_40] : memref<2x256x512xbf16, #tpu.memory_space<vmem>>, vector<1x128x512xbf16>
    %66 = vector.shape_cast %65 : vector<1x128x512xbf16> to vector<128x512xbf16>
    %cst_41 = arith.constant dense<0.000000e+00> : vector<16x512xf32>
    %67 = tpu.matmul %52, %64, %cst_41 {dimension_numbers = #tpu.dot_dimension_numbers<[1], [0], [0], [1], [0, 0, 1, 1], [], []>} : vector<16x128xbf16>, vector<128x512xbf16>, vector<16x512xf32> -> vector<16x512xf32>
    %68 = arith.truncf %60 : vector<16x128xf32> to vector<16x128xbf16>
    %cst_42 = arith.constant dense<0.000000e+00> : vector<16x512xf32>
    %69 = tpu.matmul %68, %66, %cst_42 {dimension_numbers = #tpu.dot_dimension_numbers<[1], [0], [0], [1], [0, 0, 1, 1], [], []>} : vector<16x128xbf16>, vector<128x512xbf16>, vector<16x512xf32> -> vector<16x512xf32>
    %70 = arith.addf %67, %69 : vector<16x512xf32>
    %c1_43 = arith.constant 1 : index
    %c0_44 = arith.constant 0 : index
    %c0_45 = arith.constant 0 : index
    %71 = vector.load %arg6[%c1_43, %c0_44, %c0_45] : memref<2x1x512xf32, #tpu.memory_space<vmem>>, vector<1x1x512xf32>
    %72 = vector.shape_cast %71 : vector<1x1x512xf32> to vector<1x512xf32>
    %73 = vector.broadcast %72 : vector<1x512xf32> to vector<16x512xf32>
    %74 = arith.addf %70, %73 : vector<16x512xf32>
    %75 = vector.extract_strided_slice %74 {offsets = [0, 0], sizes = [16, 128], strides = [1, 1]} : vector<16x512xf32> to vector<16x128xf32>
    %76 = arith.negf %75 : vector<16x128xf32>
    %77 = math.exp %76 : vector<16x128xf32>
    %cst_46 = arith.constant 1.000000e+00 : f32
    %78 = vector.broadcast %cst_46 : f32 to vector<16x128xf32>
    %79 = arith.addf %78, %77 : vector<16x128xf32>
    %80 = arith.divf %78, %79 : vector<16x128xf32>
    %81 = vector.extract_strided_slice %74 {offsets = [0, 128], sizes = [16, 128], strides = [1, 1]} : vector<16x512xf32> to vector<16x128xf32>
    %82 = arith.negf %81 : vector<16x128xf32>
    %83 = math.exp %82 : vector<16x128xf32>
    %cst_47 = arith.constant 1.000000e+00 : f32
    %84 = vector.broadcast %cst_47 : f32 to vector<16x128xf32>
    %85 = arith.addf %84, %83 : vector<16x128xf32>
    %86 = arith.divf %84, %85 : vector<16x128xf32>
    %87 = vector.extract_strided_slice %74 {offsets = [0, 256], sizes = [16, 128], strides = [1, 1]} : vector<16x512xf32> to vector<16x128xf32>
    %88 = math.tanh %87 : vector<16x128xf32>
    %89 = vector.extract_strided_slice %74 {offsets = [0, 384], sizes = [16, 128], strides = [1, 1]} : vector<16x512xf32> to vector<16x128xf32>
    %90 = arith.negf %89 : vector<16x128xf32>
    %91 = math.exp %90 : vector<16x128xf32>
    %cst_48 = arith.constant 1.000000e+00 : f32
    %92 = vector.broadcast %cst_48 : f32 to vector<16x128xf32>
    %93 = arith.addf %92, %91 : vector<16x128xf32>
    %94 = arith.divf %92, %93 : vector<16x128xf32>
    %95 = arith.mulf %86, %62 : vector<16x128xf32>
    %96 = arith.mulf %80, %88 : vector<16x128xf32>
    %97 = arith.addf %95, %96 : vector<16x128xf32>
    %98 = math.tanh %97 : vector<16x128xf32>
    %99 = arith.mulf %94, %98 : vector<16x128xf32>
    %100 = arith.truncf %99 : vector<16x128xf32> to vector<16x128xbf16>
    %c1_49 = arith.constant 1 : index
    %c0_50 = arith.constant 0 : index
    %c0_51 = arith.constant 0 : index
    %101 = vector.load %arg10[%c1_49, %c0_50, %c0_51] : memref<2x16x128xf32, #tpu.memory_space<vmem>>, vector<1x16x128xf32>
    %102 = vector.shape_cast %101 : vector<1x16x128xf32> to vector<16x128xf32>
    %103 = vector.shape_cast %99 : vector<16x128xf32> to vector<1x16x128xf32>
    tpu.vector_store %arg10[%c1_49, %c0_50, %c0_51], %103 {strides = array<i32>} : memref<2x16x128xf32, #tpu.memory_space<vmem>>, vector<1x16x128xf32>,
    %c1_52 = arith.constant 1 : index
    %c0_53 = arith.constant 0 : index
    %c0_54 = arith.constant 0 : index
    %104 = vector.load %arg11[%c1_52, %c0_53, %c0_54] : memref<2x16x128xf32, #tpu.memory_space<vmem>>, vector<1x16x128xf32>
    %105 = vector.shape_cast %104 : vector<1x16x128xf32> to vector<16x128xf32>
    %106 = vector.shape_cast %97 : vector<16x128xf32> to vector<1x16x128xf32>
    tpu.vector_store %arg11[%c1_52, %c0_53, %c0_54], %106 {strides = array<i32>} : memref<2x16x128xf32, #tpu.memory_space<vmem>>, vector<1x16x128xf32>,
    %c0_55 = arith.constant 0 : index
    %c0_56 = arith.constant 0 : index
    %107 = vector.load %arg7[%c0_55, %c0_56] : memref<128x256xbf16, #tpu.memory_space<vmem>>, vector<128x256xbf16>
    %cst_57 = arith.constant dense<0.000000e+00> : vector<16x256xf32>
    %108 = tpu.matmul %100, %107, %cst_57 {dimension_numbers = #tpu.dot_dimension_numbers<[1], [0], [0], [1], [0, 0, 1, 1], [], []>} : vector<16x128xbf16>, vector<128x256xbf16>, vector<16x256xf32> -> vector<16x256xf32>
    %c0_58 = arith.constant 0 : index
    %c0_59 = arith.constant 0 : index
    %109 = vector.load %arg8[%c0_58, %c0_59] : memref<1x256xf32, #tpu.memory_space<vmem>>, vector<1x256xf32>
    %110 = vector.broadcast %109 : vector<1x256xf32> to vector<16x256xf32>
    %111 = arith.addf %108, %110 : vector<16x256xf32>
    %c0_60 = arith.constant 0 : index
    %c0_61 = arith.constant 0 : index
    %112 = vector.load %arg9[%c0_60, %c0_61] : memref<16x256xf32, #tpu.memory_space<vmem>>, vector<16x256xf32>
    tpu.vector_store %arg9[%c0_60, %c0_61], %111 {strides = array<i32>} : memref<16x256xf32, #tpu.memory_space<vmem>>, vector<16x256xf32>,
    return
  }
  func.func @transform_0(%arg0: i32) -> (i32, i32) {
    %c0_i32 = arith.constant 0 : i32
    %c0_i32_0 = arith.constant 0 : i32
    %c0_i32_1 = arith.constant 0 : i32
    return %c0_i32, %c0_i32_0 : i32, i32
  }
  func.func @transform_1(%arg0: i32) -> (i32, i32) {
    %c0_i32 = arith.constant 0 : i32
    %c0_i32_0 = arith.constant 0 : i32
    %c0_i32_1 = arith.constant 0 : i32
    return %c0_i32, %c0_i32_0 : i32, i32
  }
  func.func @transform_2(%arg0: i32) -> (i32, i32, i32) {
    %c0_i32 = arith.constant 0 : i32
    %c0_i32_0 = arith.constant 0 : i32
    %c0_i32_1 = arith.constant 0 : i32
    %c0_i32_2 = arith.constant 0 : i32
    return %c0_i32, %c0_i32_0, %c0_i32_1 : i32, i32, i32
  }
  func.func @transform_3(%arg0: i32) -> (i32, i32, i32) {
    %c0_i32 = arith.constant 0 : i32
    %c0_i32_0 = arith.constant 0 : i32
    %c0_i32_1 = arith.constant 0 : i32
    %c0_i32_2 = arith.constant 0 : i32
    return %c0_i32, %c0_i32_0, %c0_i32_1 : i32, i32, i32
  }
  func.func @transform_4(%arg0: i32) -> (i32, i32, i32) {
    %c0_i32 = arith.constant 0 : i32
    %c0_i32_0 = arith.constant 0 : i32
    %c0_i32_1 = arith.constant 0 : i32
    %c0_i32_2 = arith.constant 0 : i32
    return %c0_i32, %c0_i32_0, %c0_i32_1 : i32, i32, i32
  }
  func.func @transform_5(%arg0: i32) -> (i32, i32, i32) {
    %c0_i32 = arith.constant 0 : i32
    %c0_i32_0 = arith.constant 0 : i32
    %c0_i32_1 = arith.constant 0 : i32
    %c0_i32_2 = arith.constant 0 : i32
    return %c0_i32, %c0_i32_0, %c0_i32_1 : i32, i32, i32
  }
  func.func @transform_6(%arg0: i32) -> (i32, i32) {
    %c0_i32 = arith.constant 0 : i32
    %c0_i32_0 = arith.constant 0 : i32
    %c0_i32_1 = arith.constant 0 : i32
    return %c0_i32, %c0_i32_0 : i32, i32
  }
  func.func @transform_7(%arg0: i32) -> (i32, i32) {
    %c0_i32 = arith.constant 0 : i32
    %c0_i32_0 = arith.constant 0 : i32
    %c0_i32_1 = arith.constant 0 : i32
    return %c0_i32, %c0_i32_0 : i32, i32
  }
  func.func @transform_8(%arg0: i32) -> (i32, i32) {
    %c0_i32 = arith.constant 0 : i32
    %c0_i32_0 = arith.constant 0 : i32
    %c0_i32_1 = arith.constant 0 : i32
    return %c0_i32, %c0_i32_0 : i32, i32
  }
  func.func @transform_9(%arg0: i32) -> (i32, i32, i32) {
    %c0_i32 = arith.constant 0 : i32
    %c0_i32_0 = arith.constant 0 : i32
    %c0_i32_1 = arith.constant 0 : i32
    %c0_i32_2 = arith.constant 0 : i32
    return %c0_i32, %c0_i32_0, %c0_i32_1 : i32, i32, i32
  }
  func.func @transform_10(%arg0: i32) -> (i32, i32, i32) {
    %c0_i32 = arith.constant 0 : i32
    %c0_i32_0 = arith.constant 0 : i32
    %c0_i32_1 = arith.constant 0 : i32
    %c0_i32_2 = arith.constant 0 : i32
    return %c0_i32, %c0_i32_0, %c0_i32_1 : i32, i32, i32
  }
}

</mosaic_0001>

<bundles_post_ra>
// kernel: decoder_forward.1
= control target key start
LH: loop header
LB: loop body
LE: loop exit
PB: predicated region body
PF: predicated region fallthrough
CT: control target
= control target key end

     0   :  { %16 = vsyncpa [#allocation3], 0  ;;  %s3418_s0 = inlined_call_operand.vmem [shape: s32[16,1], index: 0, kind: input, shape index: {}]   ;;  %s3419_s1 = inlined_call_operand.hbm [shape: bf16[384,128], index: 1, kind: input, shape index: {}]   ;;  %s3420_s2 = inlined_call_operand.hbm [shape: f32[2,16,128], index: 2, kind: input, shape index: {}, may-alias: {2,9}]   ;;  %s3421_s3 = inlined_call_operand.hbm [shape: f32[2,16,128], index: 3, kind: input, shape index: {}, may-alias: {3,10}]   ;;  %s3422_s4 = inlined_call_operand.hbm [shape: bf16[2,256,512], index: 4, kind: input, shape index: {}]   ;;  %s3423_s5 = inlined_call_operand.vmem [shape: f32[2,1,512], index: 5, kind: input, shape index: {}]   ;;  %s3424_s6 = inlined_call_operand.hbm [shape: bf16[128,256], index: 6, kind: input, shape index: {}]   ;;  %s3425_s7 = inlined_call_operand.vmem [shape: f32[1,256], index: 7, kind: input, shape index: {}]   ;;  %s3426_s8 = inlined_call_operand.hbm [shape: f32[16,256], index: 8, kind: output, shape index: {0}]   ;;  %s3427_s9 = inlined_call_operand.hbm [shape: f32[2,16,128], index: 9, kind: output, shape index: {1}, may-alias: {2,9}]   ;;  %s3428_s10 = inlined_call_operand.hbm [shape: f32[2,16,128], index: 10, kind: output, shape index: {2}, may-alias: {3,10}]  }
   0x1   :  { %17 = vsyncpa [#allocation6], 0 }
   0x2   :  { %18 = vsyncpa [#allocation9], 0 }
   0x3   :  { %19 = vsyncpa [#allocation4], 0  ;;  %s40_s15 = sshll.u32 %s3420_s2, 4  ;;  %s41_s15 = int_to_ptr.hbm [resolvable:$true] %s40_s15 }
   0x4   :  { %20 = vsyncpa [#allocation13], 0  ;;  %s3012_s16 = smov [#allocation5]   ;;  %s66_s20 = sshll.u32 %s3422_s4, 4  ;;  %s67_s20 = int_to_ptr.hbm [resolvable:$true] %s66_s20 }
   0x5   :  { %s42_s17 = sshll.u32 %s3012_s16, 4  ;;  %s3013_s21 = smov 128   ;;  %s43_s17 = int_to_ptr.vmem [resolvable:$true] %s42_s17 }
   0x6   :  { %s3014_s22 = smov 8   ;;  %s3015_s23 = smov [#allocation8]  }
   0x7   :  { %48 = dma.hbm_to_vmem [thread:$0]  %s41_s15, 512, %s43_s17, [#allocation6], %s3013_s21, %s3013_s21, %s3014_s22  }
   0x8   :  { %s68_s24 = sshll.u32 %s3015_s23, 4  ;;  %s3016_s2 = smov 256   ;;  %s69_s24 = int_to_ptr.vmem [resolvable:$true] %s68_s24 }
   0x9   :  { %s3017_s25 = smov 16   ;;  %s27_s4 = sshll.u32 %s3419_s1, 4  ;;  %s28_s4 = int_to_ptr.hbm [resolvable:$true] %s27_s4 }
   0xa   :  { %74 = dma.hbm_to_vmem [thread:$0]  %s67_s20, 16384, %s69_s24, [#allocation9], %s3016_s2, %s3016_s2, %s3017_s25  }
   0xb   :  { %s3018_s28 = smov [#allocation2]   ;;  %s53_s12 = sshll.u32 %s3421_s3, 4  ;;  %s54_s12 = int_to_ptr.hbm [resolvable:$true] %s53_s12 }
   0xc   :  { %s29_s29 = sshll.u32 %s3018_s28, 4  ;;  %s3019_s13 = smov 64   ;;  %s30_s29 = int_to_ptr.vmem [resolvable:$true] %s29_s29 }
   0xd   :  { %s3020_s14 = smov 4   ;;  %s3021_s15 = smov [#allocation7]  }
   0xe   :  { %35 = dma.hbm_to_vmem [thread:$0]  %s28_s4, 3072, %s30_s29, [#allocation3], %s3019_s13, %s3019_s13, %s3020_s14  }
   0xf   :  { %s55_s16 = sshll.u32 %s3021_s15, 4  ;;  %s81_s19 = sshll.u32 %s3424_s6, 4  ;;  %s56_s16 = int_to_ptr.vmem [resolvable:$true] %s55_s16  ;;  %s82_s19 = int_to_ptr.hbm [resolvable:$true] %s81_s19 }
  0x10   :  { %61 = dma.hbm_to_vmem [thread:$0]  %s54_s12, 512, %s56_s16, [#allocation6], %s3013_s21, %s3013_s21, %s3014_s22  }
  0x11   :  { %s3022_s1 = smov [#allocation10]  }
  0x12   :  { %s83_s20 = sshll.u32 %s3022_s1, 4  ;;  %s84_s20 = int_to_ptr.vmem [resolvable:$true] %s83_s20 }
  0x13   :  { %89 = dma.hbm_to_vmem [thread:$0]  %s82_s19, 2048, %s84_s20, [#allocation9], %s3013_s21, %s3013_s21, %s3014_s22  }
  0x14   :  { %3002 = dma.done.wait [#allocation3], 3072  }
  0x15   :  { %3003 = vsyncadd [#allocation3], 4294964224 }
  0x16   :  { %3004 = dma.done.wait [#allocation6], 1024  }
  0x17   :  { %3005 = vsyncadd [#allocation6], 4294966272 }
  0x18   :  { %3006 = dma.done.wait [#allocation9], 18432  }
  0x19   :  { %3007 = vsyncadd [#allocation9], 4294948864  ;;  %v3023_v0 = vmov 0   ;;  %v112_v1 = vld [vmem:[%s3418_s0] sm:$0xff]  ;;  %v2568_v2 = vld [vmem:[#allocation2 + $0x38] sm:$0xff]  ;;  %s1833_s29 = sshll.u32 %s3427_s9, 4  ;;  %s1834_s29 = int_to_ptr.hbm [resolvable:$true] %s1833_s29 }
  0x1a   :  { %2745 = vset.pattern.permute.xlu0 %v3023_v0  ;;  %v2576_v3 = vld [vmem:[#allocation2 + $0x78] sm:$0xff]  ;;  %331 = vmatpush.bf16.msra.mxu0 %v2568_v2  ;;  %v2567_v5 = vld [vmem:[#allocation2 + $0x30] sm:$0xff]  ;;  %v113_v8 = vld [vmem:[%s3418_s0 + $0x8] sm:$0xff]  ;;  %s3025_s30 = smov [#allocation12]   ;;  %s1846_s14 = sshll.u32 %s3428_s10, 4  ;;  %s1847_s14 = int_to_ptr.hbm [resolvable:$true] %s1846_s14 }
  0x1b   :  { %119 = vperm.xlu0 %2745, %v112_v1   ;;  %v2584_v4 = vld [vmem:[#allocation2 + $0xb8] sm:$0xff]  ;;  %345 = vmatpush.bf16.msra.mxu1 %v2576_v3  ;;  %v2575_v6 = vld [vmem:[#allocation2 + $0x70] sm:$0xff]  ;;  %v2566_v9 = vld [vmem:[#allocation2 + $0x28] sm:$0xff]  ;;  %s1831_s11 = sshll.u32 %s3025_s30, 4  ;;  %s3026_s15 = smov [#allocation14]   ;;  %s1832_s11 = int_to_ptr.vmem [resolvable:$true] %s1831_s11 }
  0x1c   :  { %359 = vmatpush.bf16.msra.mxu2 %v2584_v4  ;;  %v2583_v7 = vld [vmem:[#allocation2 + $0xb0] sm:$0xff]  ;;  %v2574_v10 = vld [vmem:[#allocation2 + $0x68] sm:$0xff]  ;;  %v2565_v12 = vld [vmem:[#allocation2 + $0x20] sm:$0xff]  ;;  %s1844_s16 = sshll.u32 %s3026_s15, 4  ;;  %s3027_s10 = smov [#allocation11]   ;;  %s1845_s16 = int_to_ptr.vmem [resolvable:$true] %s1844_s16 }
  0x1d   :  { %v2582_v11 = vld [vmem:[#allocation2 + $0xa8] sm:$0xff]  ;;  %v2573_v13 = vld [vmem:[#allocation2 + $0x60] sm:$0xff]  ;;  %v2564_v15 = vld [vmem:[#allocation2 + $0x18] sm:$0xff]  ;;  %s1818_s18 = sshll.u32 %s3027_s10, 4  ;;  %s1819_s18 = int_to_ptr.vmem [resolvable:$true] %s1818_s18 }
  0x1e   :  { %332 = vmatpush.bf16.msra.mxu0 %v2567_v5  ;;  %v2581_v14 = vld [vmem:[#allocation2 + $0xa0] sm:$0xff]  ;;  %v2572_v16 = vld [vmem:[#allocation2 + $0x58] sm:$0xff]  ;;  %v2563_v18 = vld [vmem:[#allocation2 + $0x10] sm:$0xff] }
  0x1f   :  { %346 = vmatpush.bf16.msra.mxu1 %v2575_v6  ;;  %v2580_v17 = vld [vmem:[#allocation2 + $0x98] sm:$0xff]  ;;  %v2571_v19 = vld [vmem:[#allocation2 + $0x50] sm:$0xff]  ;;  %v2562_v21 = vld [vmem:[#allocation2 + $0x8] sm:$0xff] }
  0x20   :  { %360 = vmatpush.bf16.msra.mxu2 %v2583_v7  ;;  %v2579_v20 = vld [vmem:[#allocation2 + $0x90] sm:$0xff]  ;;  %v2570_v22 = vld [vmem:[#allocation2 + $0x48] sm:$0xff]  ;;  %v2561_v24 = vld [vmem:[#allocation2] sm:$0xff] }
  0x21   :  { %v2578_v23 = vld [vmem:[#allocation2 + $0x88] sm:$0xff]  ;;  %v2569_v25 = vld [vmem:[#allocation2 + $0x40] sm:$0xff]  ;;  %v2647_v28 = vld [vmem:[#allocation8 + $0x1ec] sm:$0xf0] }
  0x22   :  { %333 = vmatpush.bf16.msra.mxu0 %v2566_v9  ;;  %v2577_v26 = vld [vmem:[#allocation2 + $0x80] sm:$0xff]  ;;  %v2088_v31 = vld [vmem:[#allocation8 + $0x1f0] sm:$0xf0]  ;;  %v2094_v32 = vld [vmem:[#allocation8 + $0x1e8] sm:$0xf] }
  0x23   :  { %122 = vperm.xlu0 %2745, %v113_v8   ;;  %347 = vmatpush.bf16.msra.mxu1 %v2574_v10  ;;  %v2086_v27 = vld [vmem:[#allocation8 + $0x1e0] sm:$0xf]  ;;  %v2645_v29 = vld [vmem:[#allocation8 + $0x1e4] sm:$0xf]  ;;  %v2648_v33 = vld [vmem:[#allocation8 + $0x1f4] sm:$0xf0] }
  0x24   :  { %361 = vmatpush.bf16.msra.mxu2 %v2582_v11  ;;  %v2087_v30 = vor.u32 %v2647_v28, %v2086_v27  ;;  %v2091_v34 = vor.u32 %v2645_v29, %v2088_v31  ;;  %v2095_v35 = vor.u32 %v2648_v33, %v2094_v32  ;;  %v2646_v36 = vld [vmem:[#allocation8 + $0x1ec] sm:$0xf]  ;;  %v2096_v37 = vld [vmem:[#allocation8 + $0x1f8] sm:$0xf0]  ;;  %v2070_v38 = vld [vmem:[#allocation8 + $0x1c0] sm:$0xf] }
  0x25   :  { %v2099_v39 = vor.u32 %v2646_v36, %v2096_v37  ;;  %v2643_v40 = vld [vmem:[#allocation8 + $0x1cc] sm:$0xf0]  ;;  %v2641_v41 = vld [vmem:[#allocation8 + $0x1c4] sm:$0xf]  ;;  %v2072_v42 = vld [vmem:[#allocation8 + $0x1d0] sm:$0xf0] }
  0x26   :  { %334 = vmatpush.bf16.msra.mxu0 %v2565_v12  ;;  %603 = vmatpush.bf16.msra.mxu3 %v2087_v30  ;;  %v2071_v43 = vor.u32 %v2643_v40, %v2070_v38  ;;  %v2075_v44 = vor.u32 %v2641_v41, %v2072_v42  ;;  %v2078_v45 = vld [vmem:[#allocation8 + $0x1c8] sm:$0xf]  ;;  %v2644_v46 = vld [vmem:[#allocation8 + $0x1d4] sm:$0xf0]  ;;  %v2642_v47 = vld [vmem:[#allocation8 + $0x1cc] sm:$0xf] }
  0x27   :  { %348 = vmatpush.bf16.msra.mxu1 %v2573_v13  ;;  %v2079_v48 = vor.u32 %v2644_v46, %v2078_v45  ;;  %v2080_v49 = vld [vmem:[#allocation8 + $0x1d8] sm:$0xf0]  ;;  %v2054_v50 = vld [vmem:[#allocation8 + $0x1a0] sm:$0xf]  ;;  %v2639_v51 = vld [vmem:[#allocation8 + $0x1ac] sm:$0xf0] }
  0x28   :  { %362 = vmatpush.bf16.msra.mxu2 %v2581_v14  ;;  %v2083_v52 = vor.u32 %v2642_v47, %v2080_v49  ;;  %v2637_v53 = vld [vmem:[#allocation8 + $0x1a4] sm:$0xf]  ;;  %v2056_v54 = vld [vmem:[#allocation8 + $0x1b0] sm:$0xf0]  ;;  %v2062_v55 = vld [vmem:[#allocation8 + $0x1a8] sm:$0xf]  ;;  %v2055_v56 = vor.u32 %v2639_v51, %v2054_v50 }
  0x29   :  { %v2640_v57 = vld [vmem:[#allocation8 + $0x1b4] sm:$0xf0]  ;;  %v2638_v58 = vld [vmem:[#allocation8 + $0x1ac] sm:$0xf]  ;;  %v2064_v59 = vld [vmem:[#allocation8 + $0x1b8] sm:$0xf0]  ;;  %v2059_v60 = vor.u32 %v2637_v53, %v2056_v54 }
  0x2a   :  { %335 = vmatpush.bf16.msra.mxu0 %v2564_v15  ;;  %604 = vmatpush.bf16.msra.mxu3 %v2071_v43  ;;  %v2063_v61 = vor.u32 %v2640_v57, %v2062_v55  ;;  %v2038_v62 = vld [vmem:[#allocation8 + $0x180] sm:$0xf]  ;;  %v2635_v63 = vld [vmem:[#allocation8 + $0x18c] sm:$0xf0]  ;;  %v2633_v0 = vld [vmem:[#allocation8 + $0x184] sm:$0xf]  ;;  %v2067_v1 = vor.u32 %v2638_v58, %v2064_v59 }
  0x2b   :  { %349 = vmatpush.bf16.msra.mxu1 %v2572_v16  ;;  %v2040_v2 = vld [vmem:[#allocation8 + $0x190] sm:$0xf0]  ;;  %v2046_v3 = vld [vmem:[#allocation8 + $0x188] sm:$0xf]  ;;  %v2636_v4 = vld [vmem:[#allocation8 + $0x194] sm:$0xf0]  ;;  %v2039_v7 = vor.u32 %v2635_v63, %v2038_v62 }
  0x2c   :  { %363 = vmatpush.bf16.msra.mxu2 %v2580_v17  ;;  %v2634_v5 = vld [vmem:[#allocation8 + $0x18c] sm:$0xf]  ;;  %v2048_v6 = vld [vmem:[#allocation8 + $0x198] sm:$0xf0]  ;;  %v2043_v8 = vor.u32 %v2633_v0, %v2040_v2  ;;  %v2047_v9 = vor.u32 %v2636_v4, %v2046_v3  ;;  %v2022_v10 = vld [vmem:[#allocation8 + $0x160] sm:$0xf] }
  0x2d   :  { %v2631_v11 = vld [vmem:[#allocation8 + $0x16c] sm:$0xf0]  ;;  %v2629_v12 = vld [vmem:[#allocation8 + $0x164] sm:$0xf]  ;;  %v2051_v13 = vor.u32 %v2634_v5, %v2048_v6  ;;  %v2024_v14 = vld [vmem:[#allocation8 + $0x170] sm:$0xf0] }
  0x2e   :  { %336 = vmatpush.bf16.msra.mxu0 %v2563_v18  ;;  %605 = vmatpush.bf16.msra.mxu3 %v2055_v56  ;;  %v2030_v15 = vld [vmem:[#allocation8 + $0x168] sm:$0xf]  ;;  %v2632_v16 = vld [vmem:[#allocation8 + $0x174] sm:$0xf0]  ;;  %v2630_v17 = vld [vmem:[#allocation8 + $0x16c] sm:$0xf] }
  0x2f   :  { %350 = vmatpush.bf16.msra.mxu1 %v2571_v19  ;;  %v2032_v18 = vld [vmem:[#allocation8 + $0x178] sm:$0xf0]  ;;  %v114_v19 = vlaneseq  ;;  %v2008_v27 = vld [vmem:[#allocation8 + $0x150] sm:$0xf0]  ;;  %v2014_v28 = vld [vmem:[#allocation8 + $0x148] sm:$0xf] }
  0x30   :  { %364 = vmatpush.bf16.msra.mxu2 %v2579_v20  ;;  %v2023_v20 = vor.u32 %v2631_v11, %v2022_v10  ;;  %v2628_v29 = vld [vmem:[#allocation8 + $0x154] sm:$0xf0]  ;;  %v2626_v30 = vld [vmem:[#allocation8 + $0x14c] sm:$0xf]  ;;  %v2016_v31 = vld [vmem:[#allocation8 + $0x158] sm:$0xf0] }
  0x31   :  { %v115_v33 = vand.u32 127, %v114_v19  ;;  %v2015_v36 = vor.u32 %v2628_v29, %v2014_v28  ;;  %v1990_v37 = vld [vmem:[#allocation8 + $0x120] sm:$0xf]  ;;  %v2623_v38 = vld [vmem:[#allocation8 + $0x12c] sm:$0xf0]  ;;  %v2019_v40 = vor.u32 %v2626_v30, %v2016_v31  ;;  %v375_v11 = vld [vmem:[#allocation5 + $0x8] sm:$0xff] }
  0x32   :  { %337 = vmatpush.bf16.msra.mxu0 %v2562_v21  ;;  %606 = vmatpush.bf16.msra.mxu3 %v2039_v7  ;;  %v2027_v21 = vor.u32 %v2629_v12, %v2024_v14  ;;  %v1992_v41 = vld [vmem:[#allocation8 + $0x130] sm:$0xf0]  ;;  %v1998_v42 = vld [vmem:[#allocation8 + $0x128] sm:$0xf]  ;;  %v2624_v43 = vld [vmem:[#allocation8 + $0x134] sm:$0xf0] }
  0x33   :  { %351 = vmatpush.bf16.msra.mxu1 %v2570_v22  ;;  %v2031_v22 = vor.u32 %v2632_v16, %v2030_v15  ;;  %v2000_v45 = vld [vmem:[#allocation8 + $0x138] sm:$0xf0]  ;;  %v116_v46 = vadd.s32 128, %v115_v33  ;;  %v117_v47 = vadd.s32 256, %v115_v33  ;;  %v1974_v49 = vld [vmem:[#allocation8 + $0x100] sm:$0xf]  ;;  %v1999_v51 = vor.u32 %v2624_v43, %v1998_v42 }
  0x34   :  { %365 = vmatpush.bf16.msra.mxu2 %v2578_v23  ;;  %v2006_v23 = vld [vmem:[#allocation8 + $0x140] sm:$0xf]  ;;  %v2617_v53 = vld [vmem:[#allocation8 + $0x104] sm:$0xf]  ;;  %v1976_v54 = vld [vmem:[#allocation8 + $0x110] sm:$0xf0] }
  0x35   :  { %v1982_v56 = vld [vmem:[#allocation8 + $0x108] sm:$0xf]  ;;  %v2620_v57 = vld [vmem:[#allocation8 + $0x114] sm:$0xf0]  ;;  %v2618_v58 = vld [vmem:[#allocation8 + $0x10c] sm:$0xf]  ;;  %v1979_v0 = vor.u32 %v2617_v53, %v1976_v54 }
  0x36   :  { %338 = vmatpush.bf16.msra.mxu0 %v2561_v24  ;;  %v2627_v24 = vld [vmem:[#allocation8 + $0x14c] sm:$0xf0]  ;;  %607 = vmatpush.bf16.msra.mxu3 %v2023_v20  ;;  %v1984_v59 = vld [vmem:[#allocation8 + $0x118] sm:$0xf0]  ;;  %v2216_v2 = vld [vmem:[#allocation8 + $0xf0] sm:$0xf0]  ;;  %v1983_v7 = vor.u32 %v2620_v57, %v1982_v56 }
  0x37   :  { %352 = vmatpush.bf16.msra.mxu1 %v2569_v25  ;;  %v2625_v25 = vld [vmem:[#allocation8 + $0x144] sm:$0xf]  ;;  %v2222_v3 = vld [vmem:[#allocation8 + $0xe8] sm:$0xf]  ;;  %v2616_v4 = vld [vmem:[#allocation8 + $0xf4] sm:$0xf0] }
  0x38   :  { %366 = vmatpush.bf16.msra.mxu2 %v2577_v26  ;;  %v2035_v26 = vor.u32 %v2630_v17, %v2032_v18  ;;  %v2614_v5 = vld [vmem:[#allocation8 + $0xec] sm:$0xf]  ;;  %v2224_v6 = vld [vmem:[#allocation8 + $0xf8] sm:$0xf0]  ;;  %v374_v10 = vld [vmem:[#allocation5] sm:$0xff]  ;;  %v2223_v17 = vor.u32 %v2616_v4, %v2222_v3 }
  0x39   :  { %v3024_v12 = vmov 1.0|1.0   ;;  %v2611_v15 = vld [vmem:[#allocation8 + $0xcc] sm:$0xf0]  ;;  %v2609_v16 = vld [vmem:[#allocation8 + $0xc4] sm:$0xf]  ;;  %v2227_v18 = vor.u32 %v2614_v5, %v2224_v6 }
  0x3a   :  { %617 = vmatpush.bf16.msrb.mxu0 %v2091_v34  ;;  %v2007_v34 = vor.u32 %v2627_v24, %v2006_v23  ;;  %v2200_v19 = vld [vmem:[#allocation8 + $0xd0] sm:$0xf0]  ;;  %v2206_v20 = vld [vmem:[#allocation8 + $0xc8] sm:$0xf]  ;;  %v2208_v23 = vld [vmem:[#allocation8 + $0xd8] sm:$0xf0]  ;;  %v442_v24 = vpack.c.bf16 %v375_v11, %v374_v10 }
  0x3b   :  { %631 = vmatpush.bf16.msrb.mxu1 %v2095_v35  ;;  %v2011_v35 = vor.u32 %v2625_v25, %v2008_v27  ;;  %v2182_v27 = vld [vmem:[#allocation8 + $0xa0] sm:$0xf]  ;;  %v2607_v28 = vld [vmem:[#allocation8 + $0xac] sm:$0xf0]  ;;  %v2605_v31 = vld [vmem:[#allocation8 + $0xa4] sm:$0xf] }
  0x3c   :  { %645 = vmatpush.bf16.msrb.mxu2 %v2099_v39  ;;  %v2621_v39 = vld [vmem:[#allocation8 + $0x124] sm:$0xf]  ;;  %608 = vmatpush.bf16.msra.mxu3 %v2007_v34  ;;  %v2608_v34 = vld [vmem:[#allocation8 + $0xb4] sm:$0xf0]  ;;  %v2603_v42 = vld [vmem:[#allocation8 + $0x8c] sm:$0xf0] }
  0x3d   :  { %v1995_v50 = vor.u32 %v2621_v39, %v1992_v41  ;;  %v2166_v41 = vld [vmem:[#allocation8 + $0x80] sm:$0xf]  ;;  %v2601_v43 = vld [vmem:[#allocation8 + $0x84] sm:$0xf]  ;;  %v2599_v54 = vld [vmem:[#allocation8 + $0x6c] sm:$0xf0] }
  0x3e   :  { %618 = vmatpush.bf16.msrb.mxu0 %v2075_v44  ;;  %v2622_v44 = vld [vmem:[#allocation8 + $0x12c] sm:$0xf]  ;;  %v2150_v53 = vld [vmem:[#allocation8 + $0x60] sm:$0xf]  ;;  %v2152_v57 = vld [vmem:[#allocation8 + $0x70] sm:$0xf0] }
  0x3f   :  { %632 = vmatpush.bf16.msrb.mxu1 %v2079_v48  ;;  %v1991_v48 = vor.u32 %v2623_v38, %v1990_v37  ;;  %v2003_v55 = vor.u32 %v2622_v44, %v2000_v45  ;;  %v2183_v37 = vor.u32 %v2607_v28, %v2182_v27  ;;  %v2167_v44 = vor.u32 %v2603_v42, %v2166_v41  ;;  %v2168_v45 = vld [vmem:[#allocation8 + $0x90] sm:$0xf0]  ;;  %v2593_v3 = vld [vmem:[#allocation8 + $0x44] sm:$0xf]  ;;  %v2142_v6 = vld [vmem:[#allocation8 + $0x48] sm:$0xf] }
  0x40   :  { %646 = vmatpush.bf16.msrb.mxu2 %v2083_v52  ;;  %v2619_v52 = vld [vmem:[#allocation8 + $0x10c] sm:$0xf0]  ;;  %v2151_v56 = vor.u32 %v2599_v54, %v2150_v53  ;;  %v2136_v5 = vld [vmem:[#allocation8 + $0x50] sm:$0xf0]  ;;  %v2594_v10 = vld [vmem:[#allocation8 + $0x4c] sm:$0xf] }
  0x41   :  { %609 = vmatpush.bf16.msra.mxu3 %v1991_v48  ;;  %v1975_v63 = vor.u32 %v2619_v52, %v1974_v49  ;;  %v2171_v48 = vor.u32 %v2601_v43, %v2168_v45  ;;  %v2144_v11 = vld [vmem:[#allocation8 + $0x58] sm:$0xf0]  ;;  %v2585_v27 = vld [vmem:[#allocation8 + $0x4] sm:$0xf]  ;;  %v2356_v53 = vld [vmem:[#allocation8 + $0x3e8] sm:$0xf] }
  0x42   :  { %619 = vmatpush.bf16.msrb.mxu0 %v2059_v60  ;;  %v2214_v60 = vld [vmem:[#allocation8 + $0xe0] sm:$0xf] }
  0x43   :  { %633 = vmatpush.bf16.msrb.mxu1 %v2063_v61  ;;  %v2615_v61 = vld [vmem:[#allocation8 + $0xec] sm:$0xf0] }
  0x44   :  { %647 = vmatpush.bf16.msrb.mxu2 %v2067_v1  ;;  %v2613_v1 = vld [vmem:[#allocation8 + $0xe4] sm:$0xf] }
  0x45   :  { %v2219_v14 = vor.u32 %v2613_v1, %v2216_v2  ;;  %610 = vmatpush.bf16.msra.mxu3 %v1975_v63  ;;  %v2160_v63 = vld [vmem:[#allocation8 + $0x78] sm:$0xf0]  ;;  %v2134_v1 = vld [vmem:[#allocation8 + $0x40] sm:$0xf]  ;;  %v2595_v2 = vld [vmem:[#allocation8 + $0x4c] sm:$0xf0] }
  0x46   :  { %620 = vmatpush.bf16.msrb.mxu0 %v2043_v8  ;;  %v1987_v8 = vor.u32 %v2618_v58, %v1984_v59  ;;  %v2158_v58 = vld [vmem:[#allocation8 + $0x68] sm:$0xf]  ;;  %v2600_v59 = vld [vmem:[#allocation8 + $0x74] sm:$0xf0]  ;;  %v2135_v4 = vor.u32 %v2595_v2, %v2134_v1 }
  0x47   :  { %634 = vmatpush.bf16.msrb.mxu1 %v2047_v9  ;;  %v2198_v9 = vld [vmem:[#allocation8 + $0xc0] sm:$0xf]  ;;  %v2340_v1 = vld [vmem:[#allocation8 + $0x3c8] sm:$0xf]  ;;  %v2708_v2 = vld [vmem:[#allocation8 + $0x3d4] sm:$0xf0] }
  0x48   :  { %648 = vmatpush.bf16.msrb.mxu2 %v2051_v13  ;;  %v2215_v13 = vor.u32 %v2615_v61, %v2214_v60  ;;  %v2199_v25 = vor.u32 %v2611_v15, %v2198_v9  ;;  %611 = vmatmul.bf16.vlgmr.msra.gmra.mxu3 %v442_v24  ;;  %v2159_v61 = vor.u32 %v2600_v59, %v2158_v58  ;;  %v2589_v15 = vld [vmem:[#allocation8 + $0x24] sm:$0xf]  ;;  %v2358_v58 = vld [vmem:[#allocation8 + $0x3f8] sm:$0xf0] }
  0x4a   :  { %621 = vmatpush.bf16.msrb.mxu0 %v2027_v21  ;;  %v2612_v21 = vld [vmem:[#allocation8 + $0xd4] sm:$0xf0]  ;;  %819 = vmatpush.bf16.msrb.mxu3 %v2215_v13  ;;  %v2118_v13 = vld [vmem:[#allocation8 + $0x20] sm:$0xf] }
  0x4b   :  { %635 = vmatpush.bf16.msrb.mxu1 %v2031_v22  ;;  %v2610_v22 = vld [vmem:[#allocation8 + $0xcc] sm:$0xf]  ;;  %v2207_v29 = vor.u32 %v2612_v21, %v2206_v20 }
  0x4c   :  { %649 = vmatpush.bf16.msrb.mxu2 %v2035_v26  ;;  %v2203_v26 = vor.u32 %v2609_v16, %v2200_v19  ;;  %v2211_v30 = vor.u32 %v2610_v22, %v2208_v23  ;;  %v2592_v19 = vld [vmem:[#allocation8 + $0x34] sm:$0xf0]  ;;  %v2590_v22 = vld [vmem:[#allocation8 + $0x2c] sm:$0xf]  ;;  %v2128_v23 = vld [vmem:[#allocation8 + $0x38] sm:$0xf0] }
  0x4e   :  { %622 = vmatpush.bf16.msrb.mxu0 %v2011_v35  ;;  %v2606_v35 = vld [vmem:[#allocation8 + $0xac] sm:$0xf]  ;;  %820 = vmatpush.bf16.msrb.mxu3 %v2199_v25  ;;  %v2102_v25 = vld [vmem:[#allocation8] sm:$0xf] }
  0x4f   :  { %636 = vmatpush.bf16.msrb.mxu1 %v2015_v36  ;;  %v2192_v36 = vld [vmem:[#allocation8 + $0xb8] sm:$0xf0] }
  0x50   :  { %650 = vmatpush.bf16.msrb.mxu2 %v2019_v40  ;;  %v2195_v40 = vor.u32 %v2606_v35, %v2192_v36  ;;  %v2112_v35 = vld [vmem:[#allocation8 + $0x18] sm:$0xf0] }
  0x52   :  { %623 = vmatpush.bf16.msrb.mxu0 %v1995_v50  ;;  %821 = vmatpush.bf16.msrb.mxu3 %v2183_v37  ;;  %v2602_v50 = vld [vmem:[#allocation8 + $0x8c] sm:$0xf] }
  0x53   :  { %637 = vmatpush.bf16.msrb.mxu1 %v1999_v51  ;;  %v2176_v51 = vld [vmem:[#allocation8 + $0x98] sm:$0xf0] }
  0x54   :  { %651 = vmatpush.bf16.msrb.mxu2 %v2003_v55  ;;  %v2179_v52 = vor.u32 %v2602_v50, %v2176_v51  ;;  %v2597_v55 = vld [vmem:[#allocation8 + $0x64] sm:$0xf] }
  0x55   :  { %v2155_v60 = vor.u32 %v2597_v55, %v2152_v57  ;;  %v2709_v50 = vld [vmem:[#allocation8 + $0x3e4] sm:$0xf]  ;;  %v2712_v55 = vld [vmem:[#allocation8 + $0x3f4] sm:$0xf0] }
  0x56   :  { %624 = vmatpush.bf16.msrb.mxu0 %v1979_v0  ;;  %822 = vmatpush.bf16.msrb.mxu3 %v2167_v44  ;;  %v2357_v57 = vor.u32 %v2712_v55, %v2356_v53  ;;  %v2276_v53 = vld [vmem:[#allocation8 + $0x348] sm:$0xf] }
  0x57   :  { %638 = vmatpush.bf16.msrb.mxu1 %v1983_v7  ;;  %v2596_v7 = vld [vmem:[#allocation8 + $0x54] sm:$0xf0] }
  0x58   :  { %652 = vmatpush.bf16.msrb.mxu2 %v1987_v8  ;;  %v2139_v8 = vor.u32 %v2593_v3, %v2136_v5  ;;  %v2143_v9 = vor.u32 %v2596_v7, %v2142_v6  ;;  %v2706_v5 = vld [vmem:[#allocation8 + $0x3cc] sm:$0xf]  ;;  %v2342_v6 = vld [vmem:[#allocation8 + $0x3d8] sm:$0xf0] }
  0x59   :  { %v2345_v7 = vor.u32 %v2706_v5, %v2342_v6 }
  0x5a   :  { %823 = vmatpush.bf16.msrb.mxu3 %v2151_v56  ;;  %v2710_v56 = vld [vmem:[#allocation8 + $0x3ec] sm:$0xf] }
  0x5b   :  { %v2361_v59 = vor.u32 %v2710_v56, %v2358_v58  ;;  %v2278_v58 = vld [vmem:[#allocation8 + $0x358] sm:$0xf0] }
  0x5e   :  { %824 = vmatpush.bf16.msrb.mxu3 %v2135_v4  ;;  %v2341_v4 = vor.u32 %v2708_v2, %v2340_v1  ;;  %v2254_v2 = vld [vmem:[#allocation8 + $0x330] sm:$0xf0] }
  0x8d   :  { %v3116_v32 = vpop.permute.xlu0 %119 }
  0x8e   :  { %vm124_vm0 = vcmp.eq.s32.totalorder %v115_v33, %v3116_v32  ;;  %vm125_vm5 = vcmp.eq.s32.totalorder %v116_v46, %v3116_v32  ;;  %vm126_vm7 = vcmp.eq.s32.totalorder %v117_v47, %v3116_v32  ;;  %v2184_v32 = vld [vmem:[#allocation8 + $0xb0] sm:$0xf0] }
  0x8f   :  { %v2187_v38 = vor.u32 %v2605_v31, %v2184_v32  ;;  %v2588_v31 = vld [vmem:[#allocation8 + $0x14] sm:$0xf0] }
  0x95   :  { %v123_v62 = vpop.permute.xlu0 %122 }
  0x96   :  { %vm127_vm1 = vcmp.eq.s32.totalorder %v115_v33, %v123_v62  ;;  %vm128_vm2 = vcmp.eq.s32.totalorder %v116_v46, %v123_v62  ;;  %vm129_vm3 = vcmp.eq.s32.totalorder %v117_v47, %v123_v62  ;;  %v2190_v33 = vld [vmem:[#allocation8 + $0xa8] sm:$0xf]  ;;  %v2604_v47 = vld [vmem:[#allocation8 + $0x94] sm:$0xf0]  ;;  %v2598_v62 = vld [vmem:[#allocation8 + $0x6c] sm:$0xf] }
  0x97   :  { %vm1966_vm4 = vmpackc.low %vm127_vm1, %vm124_vm0  ;;  %v2191_v39 = vor.u32 %v2608_v34, %v2190_v33  ;;  %v2174_v46 = vld [vmem:[#allocation8 + $0x88] sm:$0xf]  ;;  %v2163_v0 = vor.u32 %v2598_v62, %v2160_v63  ;;  %v2586_v34 = vld [vmem:[#allocation8 + $0xc] sm:$0xf] }
  0x98   :  { %1967 = vmatmul.msk.bf16.vlgmr.msra.gmra.mxu0 %vm1966_vm4, %v3024_v12  ;;  %vm1968_vm6 = vmpackc.low %vm128_vm2, %vm125_vm5  ;;  %v2175_v49 = vor.u32 %v2604_v47, %v2174_v46  ;;  %v2115_v36 = vor.u32 %v2586_v34, %v2112_v35  ;;  %v2705_v62 = vld [vmem:[#allocation8 + $0x3c4] sm:$0xf]  ;;  %v2284_v34 = vld [vmem:[#allocation8 + $0x360] sm:$0xf] }
  0x99   :  { %1969 = vmatmul.msk.bf16.vlgmr.msra.gmra.mxu1 %vm1968_vm6, %v3024_v12  ;;  %vm1970_vm8 = vmpackc.low %vm129_vm3, %vm126_vm7  ;;  %833 = vmatpush.bf16.msra.mxu0 %v2219_v14  ;;  %v2591_v14 = vld [vmem:[#allocation8 + $0x2c] sm:$0xf0] }
  0x9a   :  { %1971 = vmatmul.msk.bf16.vlgmr.msra.gmra.mxu2 %vm1970_vm8, %v3024_v12  ;;  %847 = vmatpush.bf16.msra.mxu1 %v2223_v17  ;;  %v2147_v12 = vor.u32 %v2594_v10, %v2144_v11  ;;  %v2119_v16 = vor.u32 %v2591_v14, %v2118_v13  ;;  %v2120_v17 = vld [vmem:[#allocation8 + $0x30] sm:$0xf0]  ;;  %v2701_v10 = vld [vmem:[#allocation8 + $0x3a4] sm:$0xf]  ;;  %v2324_v13 = vld [vmem:[#allocation8 + $0x3a8] sm:$0xf] }
  0x9b   :  { %861 = vmatpush.bf16.msra.mxu2 %v2227_v18  ;;  %v2126_v18 = vld [vmem:[#allocation8 + $0x28] sm:$0xf]  ;;  %v2123_v20 = vor.u32 %v2589_v15, %v2120_v17  ;;  %v2704_v14 = vld [vmem:[#allocation8 + $0x3b4] sm:$0xf0]  ;;  %v2702_v17 = vld [vmem:[#allocation8 + $0x3ac] sm:$0xf] }
  0x9c   :  { %v2127_v21 = vor.u32 %v2592_v19, %v2126_v18  ;;  %825 = vmatpush.bf16.msrb.mxu3 %v2119_v16  ;;  %v2325_v16 = vor.u32 %v2704_v14, %v2324_v13  ;;  %v2326_v18 = vld [vmem:[#allocation8 + $0x3b8] sm:$0xf0]  ;;  %v2695_v35 = vld [vmem:[#allocation8 + $0x36c] sm:$0xf0] }
  0x9d   :  { %834 = vmatpush.bf16.msra.mxu0 %v2203_v26  ;;  %v2587_v26 = vld [vmem:[#allocation8 + $0xc] sm:$0xf0] }
  0x9e   :  { %848 = vmatpush.bf16.msra.mxu1 %v2207_v29  ;;  %v2103_v28 = vor.u32 %v2587_v26, %v2102_v25  ;;  %v2104_v29 = vld [vmem:[#allocation8 + $0x10] sm:$0xf0]  ;;  %v2308_v26 = vld [vmem:[#allocation8 + $0x388] sm:$0xf] }
  0x9f   :  { %862 = vmatpush.bf16.msra.mxu2 %v2211_v30  ;;  %v2110_v30 = vld [vmem:[#allocation8 + $0x8] sm:$0xf]  ;;  %v2107_v32 = vor.u32 %v2585_v27, %v2104_v29  ;;  %v2302_v25 = vld [vmem:[#allocation8 + $0x390] sm:$0xf0]  ;;  %v2700_v27 = vld [vmem:[#allocation8 + $0x394] sm:$0xf0] }
  0xa0   :  { %v2111_v33 = vor.u32 %v2588_v31, %v2110_v30  ;;  %826 = vmatpush.bf16.msrb.mxu3 %v2103_v28  ;;  %v2309_v29 = vor.u32 %v2700_v27, %v2308_v26  ;;  %v2698_v30 = vld [vmem:[#allocation8 + $0x38c] sm:$0xf]  ;;  %v2310_v31 = vld [vmem:[#allocation8 + $0x398] sm:$0xf0] }
  0xa1   :  { %835 = vmatpush.bf16.msra.mxu0 %v2187_v38  ;;  %v2682_v27 = vld [vmem:[#allocation8 + $0x30c] sm:$0xf] }
  0xa2   :  { %849 = vmatpush.bf16.msra.mxu1 %v2191_v39 }
  0xa3   :  { %863 = vmatpush.bf16.msra.mxu2 %v2195_v40 }
  0xa5   :  { %836 = vmatpush.bf16.msra.mxu0 %v2171_v48  ;;  %v2348_v48 = vld [vmem:[#allocation8 + $0x3e0] sm:$0xf] }
  0xa6   :  { %850 = vmatpush.bf16.msra.mxu1 %v2175_v49  ;;  %v2711_v49 = vld [vmem:[#allocation8 + $0x3ec] sm:$0xf0] }
  0xa7   :  { %864 = vmatpush.bf16.msra.mxu2 %v2179_v52  ;;  %v2349_v51 = vor.u32 %v2711_v49, %v2348_v48  ;;  %v2350_v52 = vld [vmem:[#allocation8 + $0x3f0] sm:$0xf0]  ;;  %v2691_v48 = vld [vmem:[#allocation8 + $0x34c] sm:$0xf0]  ;;  %v2689_v49 = vld [vmem:[#allocation8 + $0x344] sm:$0xf] }
  0xa8   :  { %625 = vmatmul.bf16.vlgmr.msrb.gmra.mxu0 %v442_v24  ;;  %v2353_v54 = vor.u32 %v2709_v50, %v2350_v52  ;;  %v2270_v52 = vld [vmem:[#allocation8 + $0x350] sm:$0xf0] }
  0xa9   :  { %639 = vmatmul.bf16.vlgmr.msrb.gmra.mxu1 %v442_v24  ;;  %837 = vmatpush.bf16.msra.mxu0 %v2155_v60  ;;  %v2332_v60 = vld [vmem:[#allocation8 + $0x3c0] sm:$0xf]  ;;  %v2273_v55 = vor.u32 %v2689_v49, %v2270_v52  ;;  %v2673_v49 = vld [vmem:[#allocation8 + $0x2c4] sm:$0xf] }
  0xaa   :  { %653 = vmatmul.bf16.vlgmr.msrb.gmra.mxu2 %v442_v24  ;;  %851 = vmatpush.bf16.msra.mxu1 %v2159_v61  ;;  %v2131_v24 = vor.u32 %v2590_v22, %v2128_v23  ;;  %v2707_v61 = vld [vmem:[#allocation8 + $0x3cc] sm:$0xf0]  ;;  %v2697_v23 = vld [vmem:[#allocation8 + $0x384] sm:$0xf] }
  0xab   :  { %865 = vmatpush.bf16.msra.mxu2 %v2163_v0  ;;  %1256 = vmatpush.bf16.msra.mxu3 %v2349_v51  ;;  %v2333_v63 = vor.u32 %v2707_v61, %v2332_v60  ;;  %v2334_v0 = vld [vmem:[#allocation8 + $0x3d0] sm:$0xf0]  ;;  %v2699_v22 = vld [vmem:[#allocation8 + $0x38c] sm:$0xf0]  ;;  %v2305_v28 = vor.u32 %v2697_v23, %v2302_v25  ;;  %v3138_v60 = vld [vmem:[%s3423_s5] sm:$0xf] }
  0xac   :  { %v2337_v3 = vor.u32 %v2705_v62, %v2334_v0  ;;  %v2252_v62 = vld [vmem:[#allocation8 + $0x320] sm:$0xf]  ;;  %v2685_v0 = vld [vmem:[#allocation8 + $0x324] sm:$0xf]  ;;  %v880_v13 = vperm.slane %v3138_v60, 3 }
  0xad   :  { %838 = vmatpush.bf16.msra.mxu0 %v2139_v8  ;;  %v2316_v8 = vld [vmem:[#allocation8 + $0x3a0] sm:$0xf]  ;;  %v2257_v6 = vor.u32 %v2685_v0, %v2254_v2  ;;  %v2684_v23 = vld [vmem:[#allocation8 + $0x314] sm:$0xf0] }
  0xae   :  { %852 = vmatpush.bf16.msra.mxu1 %v2143_v9  ;;  %v2703_v9 = vld [vmem:[#allocation8 + $0x3ac] sm:$0xf0]  ;;  %v1026_v0 = vld [vmem:[#allocation5 + $0x18] sm:$0xff] }
  0xaf   :  { %866 = vmatpush.bf16.msra.mxu2 %v2147_v12  ;;  %1257 = vmatpush.bf16.msra.mxu3 %v2333_v63  ;;  %v2317_v11 = vor.u32 %v2703_v9, %v2316_v8  ;;  %v2318_v12 = vld [vmem:[#allocation8 + $0x3b0] sm:$0xf0]  ;;  %v2687_v63 = vld [vmem:[#allocation8 + $0x32c] sm:$0xf0]  ;;  %v2686_v8 = vld [vmem:[#allocation8 + $0x32c] sm:$0xf] }
  0xb0   :  { %v2321_v15 = vor.u32 %v2701_v10, %v2318_v12  ;;  %v2253_v1 = vor.u32 %v2687_v63, %v2252_v62  ;;  %v2262_v9 = vld [vmem:[#allocation8 + $0x338] sm:$0xf0]  ;;  %v877_v12 = vperm.slane %v3138_v60, 0  ;;  %v1025_v63 = vld [vmem:[#allocation5 + $0x10] sm:$0xff] }
  0xb1   :  { %839 = vmatpush.bf16.msra.mxu0 %v2123_v20  ;;  %v2329_v20 = vor.u32 %v2702_v17, %v2326_v18  ;;  %v2265_v14 = vor.u32 %v2686_v8, %v2262_v9  ;;  %v2681_v17 = vld [vmem:[#allocation8 + $0x304] sm:$0xf]  ;;  %v2470_v62 = vld [vmem:[#allocation8 + $0x2d8] sm:$0xf0] }
  0xb2   :  { %853 = vmatpush.bf16.msra.mxu1 %v2127_v21  ;;  %v2300_v21 = vld [vmem:[#allocation8 + $0x380] sm:$0xf]  ;;  %v2669_v8 = vld [vmem:[#allocation8 + $0x2a4] sm:$0xf] }
  0xb3   :  { %867 = vmatpush.bf16.msra.mxu2 %v2131_v24  ;;  %1258 = vmatpush.bf16.msra.mxu3 %v2317_v11  ;;  %v2301_v24 = vor.u32 %v2699_v22, %v2300_v21  ;;  %v878_v11 = vperm.slane %v3138_v60, 1  ;;  %v2238_v21 = vld [vmem:[#allocation8 + $0x310] sm:$0xf0]  ;;  %v2244_v22 = vld [vmem:[#allocation8 + $0x308] sm:$0xf] }
  0xb4   :  { %v2241_v25 = vor.u32 %v2681_v17, %v2238_v21  ;;  %v2245_v26 = vor.u32 %v2684_v23, %v2244_v22  ;;  %v2672_v17 = vld [vmem:[#allocation8 + $0x2b4] sm:$0xf0]  ;;  %v2454_v21 = vld [vmem:[#allocation8 + $0x2b8] sm:$0xf0] }
  0xb5   :  { %840 = vmatpush.bf16.msra.mxu0 %v2107_v32  ;;  %v2313_v32 = vor.u32 %v2698_v30, %v2310_v31  ;;  %v2679_v31 = vld [vmem:[#allocation8 + $0x2ec] sm:$0xf0] }
  0xb6   :  { %854 = vmatpush.bf16.msra.mxu1 %v2111_v33 }
  0xb7   :  { %868 = vmatpush.bf16.msra.mxu2 %v2115_v36  ;;  %1259 = vmatpush.bf16.msra.mxu3 %v2301_v24  ;;  %v2693_v36 = vld [vmem:[#allocation8 + $0x364] sm:$0xf] }
  0xb9   :  { %1270 = vmatpush.bf16.msrb.mxu0 %v2353_v54  ;;  %v2692_v54 = vld [vmem:[#allocation8 + $0x354] sm:$0xf0] }
  0xba   :  { %1284 = vmatpush.bf16.msrb.mxu1 %v2357_v57  ;;  %v2277_v56 = vor.u32 %v2692_v54, %v2276_v53  ;;  %v2690_v57 = vld [vmem:[#allocation8 + $0x34c] sm:$0xf]  ;;  %v2468_v54 = vld [vmem:[#allocation8 + $0x2c8] sm:$0xf] }
  0xbb   :  { %1298 = vmatpush.bf16.msrb.mxu2 %v2361_v59  ;;  %v2281_v61 = vor.u32 %v2690_v57, %v2278_v58 }
  0xbd   :  { %1271 = vmatpush.bf16.msrb.mxu0 %v2337_v3  ;;  %v2260_v3 = vld [vmem:[#allocation8 + $0x328] sm:$0xf] }
  0xbe   :  { %1285 = vmatpush.bf16.msrb.mxu1 %v2341_v4  ;;  %v2688_v4 = vld [vmem:[#allocation8 + $0x334] sm:$0xf0] }
  0xbf   :  { %1299 = vmatpush.bf16.msrb.mxu2 %v2345_v7  ;;  %v2261_v7 = vor.u32 %v2688_v4, %v2260_v3  ;;  %v1095_v4 = vpack.c.bf16 %v1026_v0, %v1025_v63 }
  0xc1   :  { %1272 = vmatpush.bf16.msrb.mxu0 %v2321_v15  ;;  %v2236_v15 = vld [vmem:[#allocation8 + $0x300] sm:$0xf] }
  0xc2   :  { %1286 = vmatpush.bf16.msrb.mxu1 %v2325_v16  ;;  %v2683_v16 = vld [vmem:[#allocation8 + $0x30c] sm:$0xf0] }
  0xc3   :  { %1300 = vmatpush.bf16.msrb.mxu2 %v2329_v20  ;;  %v2237_v20 = vor.u32 %v2683_v16, %v2236_v15  ;;  %v2446_v15 = vld [vmem:[#allocation8 + $0x2b0] sm:$0xf0]  ;;  %v2452_v16 = vld [vmem:[#allocation8 + $0x2a8] sm:$0xf] }
  0xc5   :  { %1273 = vmatpush.bf16.msrb.mxu0 %v2305_v28  ;;  %v2246_v28 = vld [vmem:[#allocation8 + $0x318] sm:$0xf0] }
  0xc6   :  { %1287 = vmatpush.bf16.msrb.mxu1 %v2309_v29  ;;  %v2476_v29 = vld [vmem:[#allocation8 + $0x2e0] sm:$0xf]  ;;  %v2249_v30 = vor.u32 %v2682_v27, %v2246_v28  ;;  %v2667_v27 = vld [vmem:[#allocation8 + $0x28c] sm:$0xf0] }
  0xc7   :  { %1301 = vmatpush.bf16.msrb.mxu2 %v2313_v32  ;;  %v2677_v32 = vld [vmem:[#allocation8 + $0x2e4] sm:$0xf] }
 0x115   :  { %v340_v37 = vpop.f32.mrf.mxu0 }
 0x116   :  { %v354_v38 = vpop.f32.mrf.mxu1 }
 0x117   :  { %v355_v42 = vadd.f32 %v354_v38, %v340_v37  ;;  %v3129_v37 = vpop.f32.mrf.mxu3  ;;  %v2285_v38 = vor.u32 %v2695_v35, %v2284_v34  ;;  %v2478_v34 = vld [vmem:[#allocation8 + $0x2f0] sm:$0xf0] }
 0x119   :  { %1260 = vmatpush.bf16.msra.mxu3 %v2285_v38  ;;  %v2481_v38 = vor.u32 %v2677_v32, %v2478_v34  ;;  %v2430_v32 = vld [vmem:[#allocation8 + $0x290] sm:$0xf0] }
 0x11d   :  { %v368_v39 = vpop.f32.mrf.mxu2  ;;  %v342_v40 = vpop.f32.mrf.mxu0 }
 0x11e   :  { %v356_v41 = vpop.f32.mrf.mxu1  ;;  %v369_v45 = vadd.f32 %v368_v39, %v355_v42  ;;  %v2286_v39 = vld [vmem:[#allocation8 + $0x370] sm:$0xf0] }
 0x11f   :  { %v357_v43 = vadd.f32 %v356_v41, %v342_v40  ;;  %v2292_v40 = vld [vmem:[#allocation8 + $0x368] sm:$0xf]  ;;  %v2696_v41 = vld [vmem:[#allocation8 + $0x374] sm:$0xf0]  ;;  %v2289_v42 = vor.u32 %v2693_v36, %v2286_v39  ;;  %v3142_v10 = vpop.f32.mrf.mxu3  ;;  %v2477_v36 = vor.u32 %v2679_v31, %v2476_v29  ;;  %v2665_v31 = vld [vmem:[#allocation8 + $0x284] sm:$0xf] }
 0x120   :  { %v2484_v39 = vld [vmem:[#allocation8 + $0x2e8] sm:$0xf] }
 0x121   :  { %1274 = vmatpush.bf16.msrb.mxu0 %v2289_v42 }
 0x125   :  { %v370_v44 = vpop.f32.mrf.mxu2  ;;  %v3125_v19 = vpop.f32.mrf.mxu0  ;;  %1275 = vmatpush.bf16.msrb.mxu0 %v2273_v55  ;;  %v2676_v55 = vld [vmem:[#allocation8 + $0x2d4] sm:$0xf0] }
 0x126   :  { %v371_v46 = vadd.f32 %v370_v44, %v357_v43  ;;  %v2293_v43 = vor.u32 %v2696_v41, %v2292_v40  ;;  %v2694_v44 = vld [vmem:[#allocation8 + $0x36c] sm:$0xf]  ;;  %v3133_v59 = vpop.f32.mrf.mxu1  ;;  %v2680_v40 = vld [vmem:[#allocation8 + $0x2f4] sm:$0xf0] }
 0x127   :  { %v2485_v42 = vor.u32 %v2680_v40, %v2484_v39  ;;  %v2668_v39 = vld [vmem:[#allocation8 + $0x294] sm:$0xf0] }
 0x128   :  { %v373_v47 = vpack.c.bf16 %v371_v46, %v369_v45  ;;  %v2294_v45 = vld [vmem:[#allocation8 + $0x378] sm:$0xf0]  ;;  %1288 = vmatpush.bf16.msrb.mxu1 %v2293_v43 }
 0x129   :  { %v2297_v46 = vor.u32 %v2694_v44, %v2294_v45  ;;  %1276 = vmatpush.bf16.msrb.mxu0 %v2257_v6  ;;  %v2486_v43 = vld [vmem:[#allocation8 + $0x2f8] sm:$0xf0]  ;;  %v2460_v44 = vld [vmem:[#allocation8 + $0x2c0] sm:$0xf]  ;;  %v2675_v45 = vld [vmem:[#allocation8 + $0x2cc] sm:$0xf0] }
 0x12a   :  { %827 = vmatmul.bf16.vlgmr.msrb.gmra.mxu3 %v373_v47  ;;  %841 = vmatmul.bf16.vlgmr.msra.gmra.mxu0 %v373_v47  ;;  %v2444_v6 = vld [vmem:[#allocation8 + $0x2a0] sm:$0xf] }
 0x12b   :  { %855 = vmatmul.bf16.vlgmr.msra.gmra.mxu1 %v373_v47  ;;  %869 = vmatmul.bf16.vlgmr.msra.gmra.mxu2 %v373_v47  ;;  %v2268_v47 = vld [vmem:[#allocation8 + $0x340] sm:$0xf] }
 0x12c   :  { %1302 = vmatpush.bf16.msrb.mxu2 %v2297_v46  ;;  %v2269_v51 = vor.u32 %v2691_v48, %v2268_v47  ;;  %1289 = vmatpush.bf16.msrb.mxu1 %v2277_v56  ;;  %v2461_v48 = vor.u32 %v2675_v45, %v2460_v44  ;;  %v2674_v56 = vld [vmem:[#allocation8 + $0x2cc] sm:$0xf]  ;;  %v2438_v44 = vld [vmem:[#allocation8 + $0x298] sm:$0xf0]  ;;  %v2412_v45 = vld [vmem:[#allocation8 + $0x260] sm:$0xf] }
 0x12d   :  { %v3127_v33 = vpop.f32.mrf.mxu2  ;;  %v3131_v50 = vpop.f32.mrf.mxu0  ;;  %1277 = vmatpush.bf16.msrb.mxu0 %v2241_v25  ;;  %v2473_v3 = vor.u32 %v2674_v56, %v2470_v62  ;;  %v2662_v56 = vld [vmem:[#allocation8 + $0x26c] sm:$0xf]  ;;  %v2422_v62 = vld [vmem:[#allocation8 + $0x278] sm:$0xf0] }
 0x12e   :  { %1261 = vmatpush.bf16.msra.mxu3 %v2269_v51  ;;  %v3150_v41 = vpop.f32.mrf.mxu1  ;;  %v2462_v51 = vld [vmem:[#allocation8 + $0x2d0] sm:$0xf0] }
 0x12f   :  { %v2465_v53 = vor.u32 %v2673_v49, %v2462_v51  ;;  %v2661_v51 = vld [vmem:[#allocation8 + $0x264] sm:$0xf] }
 0x130   :  { %1303 = vmatpush.bf16.msrb.mxu2 %v2281_v61  ;;  %1290 = vmatpush.bf16.msrb.mxu1 %v2261_v7  ;;  %v2469_v61 = vor.u32 %v2676_v55, %v2468_v54  ;;  %v2671_v7 = vld [vmem:[#allocation8 + $0x2ac] sm:$0xf0]  ;;  %v2664_v55 = vld [vmem:[#allocation8 + $0x274] sm:$0xf0] }
 0x131   :  { %1486 = vmatpush.bf16.msra.mxu0 %v2481_v38  ;;  %v2436_v38 = vld [vmem:[#allocation8 + $0x288] sm:$0xf] }
 0x132   :  { %1262 = vmatpush.bf16.msra.mxu3 %v2253_v1 }
 0x134   :  { %1304 = vmatpush.bf16.msrb.mxu2 %v2265_v14  ;;  %1291 = vmatpush.bf16.msrb.mxu1 %v2245_v26  ;;  %v2428_v26 = vld [vmem:[#allocation8 + $0x280] sm:$0xf] }
 0x135   :  { %v3140_v5 = vpop.f32.mrf.mxu2  ;;  %1487 = vmatpush.bf16.msra.mxu0 %v2465_v53 }
 0x136   :  { %1263 = vmatpush.bf16.msra.mxu3 %v2237_v20  ;;  %v2670_v20 = vld [vmem:[#allocation8 + $0x2ac] sm:$0xf] }
 0x138   :  { %1305 = vmatpush.bf16.msrb.mxu2 %v2249_v30  ;;  %1500 = vmatpush.bf16.msra.mxu1 %v2485_v42  ;;  %v2429_v30 = vor.u32 %v2667_v27, %v2428_v26  ;;  %v2437_v42 = vor.u32 %v2668_v39, %v2436_v38 }
 0x13a   :  { %1472 = vmatpush.bf16.msrb.mxu3 %v2477_v36  ;;  %1278 = vmatmul.bf16.vlgmr.msrb.gmra.mxu0 %v1095_v4  ;;  %v2433_v36 = vor.u32 %v2665_v31, %v2430_v32 }
 0x13b   :  { %1264 = vmatmul.bf16.vlgmr.msra.gmra.mxu3 %v1095_v4  ;;  %1292 = vmatmul.bf16.vlgmr.msrb.gmra.mxu1 %v1095_v4 }
 0x13c   :  { %1501 = vmatpush.bf16.msra.mxu1 %v2469_v61  ;;  %1306 = vmatmul.bf16.vlgmr.msrb.gmra.mxu2 %v1095_v4  ;;  %v2659_v4 = vld [vmem:[#allocation8 + $0x24c] sm:$0xf0] }
 0x13e   :  { %1473 = vmatpush.bf16.msrb.mxu3 %v2461_v48 }
 0x1a7   :  { %v842_v18 = vpop.f32.mrf.mxu0 }
 0x1a8   :  { %v843_v24 = vadd.f32 %v842_v18, %v3125_v19  ;;  %v2678_v19 = vld [vmem:[#allocation8 + $0x2ec] sm:$0xf]  ;;  %v2449_v18 = vor.u32 %v2669_v8, %v2446_v15 }
 0x1a9   :  { %v2489_v47 = vor.u32 %v2678_v19, %v2486_v43  ;;  %v2666_v43 = vld [vmem:[#allocation8 + $0x28c] sm:$0xf] }
 0x1aa   :  { %v886_v35 = vadd.f32 %v878_v11, %v843_v24  ;;  %v2457_v24 = vor.u32 %v2670_v20, %v2454_v21  ;;  %1488 = vmatpush.bf16.msra.mxu0 %v2449_v18  ;;  %v2441_v49 = vor.u32 %v2666_v43, %v2438_v44  ;;  %v2390_v43 = vld [vmem:[#allocation8 + $0x238] sm:$0xf0] }
 0x1ab   :  { %1514 = vmatpush.bf16.msra.mxu2 %v2489_v47 }
 0x1ac   :  { %v2230_v46 = vmul.f32 -1.442695, %v886_v35 }
 0x1ad   :  { %v828_v52 = vpop.f32.mrf.mxu3 }
 0x1ae   :  { %2746 = vpow2.f32 %v2230_v46  ;;  %v829_v57 = vadd.f32 %v828_v52, %v3129_v37  ;;  %v870_v58 = vpop.f32.mrf.mxu2  ;;  %v2445_v37 = vor.u32 %v2671_v7, %v2444_v6  ;;  %v2663_v46 = vld [vmem:[#allocation8 + $0x26c] sm:$0xf0]  ;;  %1489 = vmatpush.bf16.msra.mxu0 %v2433_v36  ;;  %v2414_v52 = vld [vmem:[#allocation8 + $0x270] sm:$0xf0]  ;;  %v2657_v6 = vld [vmem:[#allocation8 + $0x244] sm:$0xf] }
 0x1af   :  { %v871_v1 = vadd.f32 %v870_v58, %v3127_v33  ;;  %v844_v2 = vpop.f32.mrf.mxu0  ;;  %1515 = vmatpush.bf16.msra.mxu2 %v2473_v3  ;;  %v2413_v53 = vor.u32 %v2663_v46, %v2412_v45  ;;  %v2417_v54 = vor.u32 %v2661_v51, %v2414_v52  ;;  %v2425_v3 = vor.u32 %v2662_v56, %v2422_v62  ;;  %v2656_v36 = vld [vmem:[#allocation8 + $0x234] sm:$0xf0]  ;;  %v2651_v51 = vld [vmem:[#allocation8 + $0x20c] sm:$0xf0]  ;;  %v2649_v52 = vld [vmem:[#allocation8 + $0x204] sm:$0xf] }
 0x1b0   :  { %v885_v9 = vadd.f32 %v877_v12, %v829_v57  ;;  %v845_v14 = vadd.f32 %v844_v2, %v3131_v50  ;;  %v2453_v50 = vor.u32 %v2672_v17, %v2452_v16  ;;  %1474 = vmatpush.bf16.msrb.mxu3 %v2445_v37  ;;  %v2660_v17 = vld [vmem:[#allocation8 + $0x254] sm:$0xf0] }
 0x1b1   :  { %v888_v33 = vadd.f32 %v880_v13, %v871_v1  ;;  %v879_v1 = vperm.slane %v3138_v60, 2 }
 0x1b2   :  { %v2228_v22 = vmul.f32 -1.442695, %v885_v9  ;;  %v890_v23 = vadd.f32 %v878_v11, %v845_v14  ;;  %v856_v11 = vpop.f32.mrf.mxu1  ;;  %1502 = vmatpush.bf16.msra.mxu1 %v2453_v50  ;;  %1490 = vmatpush.bf16.msra.mxu0 %v2417_v54  ;;  %v2398_v14 = vld [vmem:[#allocation8 + $0x250] sm:$0xf0] }
 0x1b3   :  { %v2232_v25 = vmul.f32 -1.442695, %v888_v33  ;;  %1516 = vmatpush.bf16.msra.mxu2 %v2457_v24  ;;  %v857_v0 = vadd.f32 %v856_v11, %v3133_v59  ;;  %v2404_v59 = vld [vmem:[#allocation8 + $0x248] sm:$0xf]  ;;  %v2658_v33 = vld [vmem:[#allocation8 + $0x24c] sm:$0xf]  ;;  %v2401_v21 = vor.u32 %v2657_v6, %v2398_v14 }
 0x1b4   :  { %v2747_v28 = vpop.eup %2746  ;;  %2748 = vpow2.f32 %v2228_v22  ;;  %v2231_v29 = vmul.f32 -1.442695, %v890_v23  ;;  %1475 = vmatpush.bf16.msrb.mxu3 %v2429_v30  ;;  %v2406_v22 = vld [vmem:[#allocation8 + $0x258] sm:$0xf0]  ;;  %v2380_v23 = vld [vmem:[#allocation8 + $0x220] sm:$0xf] }
 0x1b5   :  { %v3161_v34 = vadd.f32 1.0, %v2747_v28  ;;  %2750 = vpow2.f32 %v2232_v25  ;;  %v830_v35 = vpop.f32.mrf.mxu3  ;;  %v887_v18 = vadd.f32 %v879_v1, %v857_v0  ;;  %v2655_v24 = vld [vmem:[#allocation8 + $0x22c] sm:$0xf0]  ;;  %v2405_v25 = vor.u32 %v2660_v17, %v2404_v59  ;;  %v2653_v28 = vld [vmem:[#allocation8 + $0x224] sm:$0xf] }
 0x1b6   :  { %2752 = vpow2.f32 %v2231_v29  ;;  %v831_v40 = vadd.f32 %v830_v35, %v3142_v10  ;;  %v872_v19 = vpop.f32.mrf.mxu2  ;;  %v2420_v10 = vld [vmem:[#allocation8 + $0x268] sm:$0xf]  ;;  %1503 = vmatpush.bf16.msra.mxu1 %v2437_v42  ;;  %1491 = vmatpush.bf16.msra.mxu0 %v2401_v21  ;;  %v2409_v26 = vor.u32 %v2658_v33, %v2406_v22  ;;  %v2381_v27 = vor.u32 %v2655_v24, %v2380_v23  ;;  %v2382_v29 = vld [vmem:[#allocation8 + $0x230] sm:$0xf0]  ;;  %v2654_v42 = vld [vmem:[#allocation8 + $0x22c] sm:$0xf] }
 0x1b7   :  { %2754 = vrcp.f32 %v3161_v34  ;;  %v873_v48 = vadd.f32 %v872_v19, %v3140_v5  ;;  %1517 = vmatpush.bf16.msra.mxu2 %v2441_v49  ;;  %v2396_v5 = vld [vmem:[#allocation8 + $0x240] sm:$0xf]  ;;  %v948_v31 = vand.u32 2147483647, %v3161_v34  ;;  %v2385_v11 = vor.u32 %v2653_v28, %v2382_v29  ;;  %v2388_v35 = vld [vmem:[#allocation8 + $0x228] sm:$0xf] }
 0x1b8   :  { %v889_v47 = vadd.f32 %v877_v12, %v831_v40  ;;  %v2421_v12 = vor.u32 %v2664_v55, %v2420_v10  ;;  %1476 = vmatpush.bf16.msrb.mxu3 %v2413_v53  ;;  %v2389_v19 = vor.u32 %v2656_v36, %v2388_v35  ;;  %v950_v45 = vand.u32 2147483648, %v3161_v34  ;;  %v2366_v10 = vld [vmem:[#allocation8 + $0x210] sm:$0xf0]  ;;  %v376_v28 = vld [vmem:[#allocation7] sm:$0xff]  ;;  %v2555_v29 = vld [vmem:[#allocation10 + $0x70] sm:$0xf] }
 0x1b9   :  { %v892_v61 = vadd.f32 %v880_v13, %v873_v48  ;;  %v2397_v13 = vor.u32 %v2659_v4, %v2396_v5  ;;  %v2364_v48 = vld [vmem:[#allocation8 + $0x200] sm:$0xf]  ;;  %vm944_vm9 = vweird.f32 %v3161_v34  ;;  %v2650_v5 = vld [vmem:[#allocation8 + $0x20c] sm:$0xf]  ;;  %v2369_v6 = vor.u32 %v2649_v52, %v2366_v10 }
 0x1ba   :  { %v2749_v57 = vpop.eup %2748  ;;  %v2229_v58 = vmul.f32 -1.442695, %v889_v47  ;;  %1504 = vmatpush.bf16.msra.mxu1 %v2421_v12  ;;  %v858_v20 = vpop.f32.mrf.mxu1  ;;  %v2393_v47 = vor.u32 %v2654_v42, %v2390_v43  ;;  %1492 = vmatpush.bf16.msra.mxu0 %v2385_v11  ;;  %v2365_v4 = vor.u32 %v2651_v51, %v2364_v48  ;;  %vm3226_vm13 = vcmp.eq.f32.partialorder %v948_v31, 8.507059e+37 }
 0x1bb   :  { %v2751_v63 = vpop.eup %2750  ;;  %v3172_v2 = vadd.f32 1.0, %v2749_v57  ;;  %v2233_v9 = vmul.f32 -1.442695, %v892_v61  ;;  %1518 = vmatpush.bf16.msra.mxu2 %v2425_v3  ;;  %v859_v32 = vadd.f32 %v858_v20, %v3150_v41  ;;  %v2372_v57 = vld [vmem:[#allocation8 + $0x208] sm:$0xf]  ;;  %v951_v33 = vor.u32 1.1754944e-38, %v950_v45 }
 0x1bc   :  { %v2753_v7 = vpop.eup %2752  ;;  %v3174_v8 = vadd.f32 1.0, %v2751_v63  ;;  %2756 = vpow2.f32 %v2229_v58  ;;  %1477 = vmatpush.bf16.msrb.mxu3 %v2397_v13  ;;  %v2652_v58 = vld [vmem:[#allocation8 + $0x214] sm:$0xf0]  ;;  %v2374_v63 = vld [vmem:[#allocation8 + $0x218] sm:$0xf0] }
 0x1bd   :  { %v3176_v37 = vpop.eup %2754  ;;  %2758 = vrcp.f32 %v3172_v2  ;;  %v3182_v16 = vadd.f32 1.0, %v2753_v7  ;;  %v910_v46 = vand.u32 2147483647, %v3172_v2  ;;  %v891_v55 = vadd.f32 %v879_v1, %v859_v32 }
 0x1be   :  { %v940_v15 = vmul.f32 %v3176_v37, %v3161_v34  ;;  %2760 = vrcp.f32 %v3174_v8  ;;  %1505 = vmatpush.bf16.msra.mxu1 %v2405_v25  ;;  %vm945_vm10 = vweird.f32 %v3176_v37  ;;  %v912_v12 = vand.u32 2147483648, %v3172_v2  ;;  %1493 = vmatpush.bf16.msra.mxu0 %v2369_v6  ;;  %v1279_v6 = vpop.f32.mrf.mxu0 }
 0x1bf   :  { %2762 = vpow2.f32 %v2233_v9  ;;  %1519 = vmatpush.bf16.msra.mxu2 %v2409_v26  ;;  %v2373_v7 = vor.u32 %v2652_v58, %v2372_v57  ;;  %vm3222_vm12 = vmor %vm944_vm9, %vm945_vm10  ;;  %vm906_vm14 = vweird.f32 %v3172_v2  ;;  %v2377_v59 = vor.u32 %v2650_v5, %v2374_v63  ;;  %v1265_v9 = vpop.f32.mrf.mxu3 }
 0x1c0   :  { %v941_v50 = vsub.f32 1.0, %v940_v15  ;;  %2764 = vrcp.f32 %v3182_v16  ;;  %1478 = vmatpush.bf16.msrb.mxu3 %v2381_v27  ;;  %vm911_vm1 = vcmp.eq.f32.partialorder %v910_v46, 8.507059e+37  ;;  %vm959_vm2 = vweird.f32 %v3182_v16 }
 0x1c1   :  { %2766 = vtanh.f32 %v887_v18  ;;  %v913_v18 = vor.u32 1.1754944e-38, %v912_v12  ;;  %v965_v23 = vand.u32 2147483648, %v3182_v16  ;;  %v963_v26 = vand.u32 2147483647, %v3182_v16 }
 0x1c2   :  { %v2757_v30 = vpop.eup %2756  ;;  %v942_v39 = vmul.f32 %v3176_v37, %v941_v50  ;;  %1506 = vmatpush.bf16.msra.mxu1 %v2389_v19  ;;  %v990_v52 = vand.u32 2147483648, %v3174_v8  ;;  %vm984_vm10 = vweird.f32 %v3174_v8 }
 0x1c3   :  { %v3189_v38 = vpop.eup %2758  ;;  %v3192_v40 = vadd.f32 1.0, %v2757_v30  ;;  %1520 = vmatpush.bf16.msra.mxu2 %v2393_v47  ;;  %v966_v36 = vor.u32 1.1754944e-38, %v965_v23  ;;  %vm964_vm5 = vcmp.eq.f32.partialorder %v963_v26, 8.507059e+37 }
 0x1c4   :  { %v3194_v44 = vpop.eup %2760  ;;  %v902_v41 = vmul.f32 %v3189_v38, %v3172_v2  ;;  %v943_v61 = vadd.f32 %v3176_v37, %v942_v39  ;;  %vm907_vm11 = vweird.f32 %v3189_v38  ;;  %1479 = vmatpush.bf16.msrb.mxu3 %v2365_v4  ;;  %v991_v58 = vor.u32 1.1754944e-38, %v990_v52  ;;  %v2549_v52 = vld [vmem:[#allocation10 + $0x68] sm:$0xf0] }
 0x1c5   :  { %v2763_v49 = vpop.eup %2762  ;;  %2768 = vrcp.f32 %v3192_v40  ;;  %v980_v0 = vmul.f32 %v3194_v44, %v3174_v8  ;;  %vm3237_vm15 = vmor %vm906_vm14, %vm907_vm11  ;;  %v925_v30 = vand.u32 2147483647, %v3192_v40  ;;  %v927_v31 = vand.u32 2147483648, %v3192_v40 }
 0x1c6   :  { %v3201_v53 = vpop.eup %2764  ;;  %v903_v54 = vsub.f32 1.0, %v902_v41  ;;  %v3206_v56 = vadd.f32 1.0, %v2763_v49  ;;  %v947_v17 = vsel %vm3222_vm12, %v3176_v37, %v943_v61  ;;  %1507 = vmatpush.bf16.msra.mxu1 %v2373_v7  ;;  %vm921_vm6 = vweird.f32 %v3192_v40  ;;  %v377_v41 = vld [vmem:[#allocation7 + $0x8] sm:$0xff]  ;;  %v1307_v7 = vpop.f32.mrf.mxu2 }
 0x1c7   :  { %v955_v62 = vmul.f32 %v3201_v53, %v3182_v16  ;;  %v2767_v1 = vpop.eup %2766  ;;  %v981_v21 = vsub.f32 1.0, %v980_v0  ;;  %vm960_vm0 = vweird.f32 %v3201_v53  ;;  %1521 = vmatpush.bf16.msra.mxu2 %v2377_v59  ;;  %v952_v24 = vsel %vm3226_vm13, %v951_v33, %v947_v17  ;;  %v1281_v13 = vpop.f32.mrf.mxu0 }
 0x1c8   :  { %v904_v60 = vmul.f32 %v3189_v38, %v903_v54  ;;  %2770 = vrcp.f32 %v3206_v56  ;;  %vm3255_vm3 = vmor %vm959_vm2, %vm960_vm0  ;;  %v1009_v39 = vmul.f32 %v952_v24, %v376_v28  ;;  %v928_v45 = vor.u32 1.1754944e-38, %v927_v31  ;;  %v2727_v31 = vld [vmem:[#allocation10 + $0x74] sm:$0xf] }
 0x1c9   :  { %v956_v3 = vsub.f32 1.0, %v955_v62  ;;  %2772 = vtanh.f32 %v891_v55  ;;  %v982_v16 = vmul.f32 %v3194_v44, %v981_v21  ;;  %vm926_vm8 = vcmp.eq.f32.partialorder %v925_v30, 8.507059e+37  ;;  %v2728_v30 = vld [vmem:[#allocation10 + $0x74] sm:$0xf0] }
 0x1ca   :  { %v905_v14 = vadd.f32 %v3189_v38, %v904_v60  ;;  %vm985_vm9 = vweird.f32 %v3194_v44  ;;  %v1005_v12 = vand.u32 2147483648, %v3206_v56  ;;  %vm999_vm14 = vweird.f32 %v3206_v56 }
 0x1cb   :  { %v2769_v15 = vpop.eup %2768  ;;  %v957_v20 = vmul.f32 %v3201_v53, %v956_v3  ;;  %v983_v48 = vadd.f32 %v3194_v44, %v982_v16  ;;  %vm986_vm11 = vmor %vm984_vm10, %vm985_vm9  ;;  %v2556_v16 = vor.u32 %v2728_v30, %v2555_v29 }
 0x1cc   :  { %v909_v2 = vsel %vm3237_vm15, %v3189_v38, %v905_v14  ;;  %v917_v37 = vmul.f32 %v2769_v15, %v3192_v40  ;;  %vm922_vm4 = vweird.f32 %v2769_v15  ;;  %v988_v40 = vand.u32 2147483647, %v3174_v8  ;;  %v3286_v14 = vld [vmem:[%s3423_s5 + $0x4] sm:$0xf] }
 0x1cd   :  { %v958_v22 = vadd.f32 %v3201_v53, %v957_v20  ;;  %v914_v25 = vsel %vm911_vm1, %v913_v18, %v909_v2  ;;  %vm923_vm7 = vmor %vm921_vm6, %vm922_vm4  ;;  %v987_v55 = vsel %vm986_vm11, %v3194_v44, %v983_v48  ;;  %v1003_v8 = vand.u32 2147483647, %v3206_v56  ;;  %1782 = vmatpush.bf16.msra.mxu3 %v2556_v16 }
 0x1ce   :  { %v3250_v50 = vpop.eup %2770  ;;  %v918_v27 = vsub.f32 1.0, %v917_v37  ;;  %v1011_v19 = vmul.f32 %v2767_v1, %v914_v25  ;;  %vm989_vm13 = vcmp.eq.f32.partialorder %v988_v40, 8.507059e+37  ;;  %v1006_v60 = vor.u32 1.1754944e-38, %v1005_v12  ;;  %v1309_v59 = vpop.f32.mrf.mxu2  ;;  %v2724_v40 = vld [vmem:[#allocation10 + $0x54] sm:$0xf0] }
 0x1cf   :  { %v995_v32 = vmul.f32 %v3250_v50, %v3206_v56  ;;  %v962_v11 = vsel %vm3255_vm3, %v3201_v53, %v958_v22  ;;  %v2773_v49 = vpop.eup %2772  ;;  %vm1000_vm12 = vweird.f32 %v3250_v50  ;;  %v992_v5 = vsel %vm989_vm13, %v991_v58, %v987_v55  ;;  %v3281_v56 = vpop.f32.mrf.mxu1  ;;  %v2541_v58 = vld [vmem:[#allocation10 + $0x58] sm:$0xf0]  ;;  %v2531_v12 = vld [vmem:[#allocation10 + $0x40] sm:$0xf] }
 0x1d0   :  { %v919_v35 = vmul.f32 %v2769_v15, %v918_v27  ;;  %v967_v43 = vsel %vm964_vm5, %v966_v36, %v962_v11  ;;  %v1013_v46 = vadd.f32 %v1011_v19, %v1009_v39  ;;  %vm1001_vm15 = vmor %vm999_vm14, %vm1000_vm12  ;;  %vm1004_vm0 = vcmp.eq.f32.partialorder %v1003_v8, 8.507059e+37  ;;  %v2557_v36 = vld [vmem:[#allocation10 + $0x78] sm:$0xf0] }
 0x1d1   :  { %v996_v38 = vsub.f32 1.0, %v995_v32  ;;  %v1010_v53 = vmul.f32 %v967_v43, %v377_v41  ;;  %v1532_v17 = vperm.slane %v3286_v14, 1  ;;  %v1531_v21 = vperm.slane %v3286_v14, 0  ;;  %v2547_v41 = vld [vmem:[#allocation10 + $0x60] sm:$0xf] }
 0x1d2   :  { %v920_v42 = vadd.f32 %v2769_v15, %v919_v35  ;;  %2774 = vtanh.f32 %v1013_v46  ;;  %1022 = vst [vmem:[#allocation14] sm:$0xff] %v1013_v46  ;;  %v1534_v22 = vperm.slane %v3286_v14, 3  ;;  %v2560_v39 = vor.u32 %v2727_v31, %v2557_v36  ;;  %v2726_v46 = vld [vmem:[#allocation10 + $0x64] sm:$0xf0]  ;;  %v2717_v31 = vld [vmem:[#allocation10 + $0x24] sm:$0xf] }
 0x1d3   :  { %v997_v10 = vmul.f32 %v3250_v50, %v996_v38 }
 0x1d4   :  { %v924_v47 = vsel %vm923_vm7, %v2769_v15, %v920_v42  ;;  %v1267_v15 = vpop.f32.mrf.mxu3  ;;  %1796 = vmatpush.bf16.msrb.mxu0 %v2560_v39 }
 0x1d5   :  { %v929_v51 = vsel %vm926_vm8, %v928_v45, %v924_v47  ;;  %v998_v61 = vadd.f32 %v3250_v50, %v997_v10  ;;  %v2539_v10 = vld [vmem:[#allocation10 + $0x50] sm:$0xf] }
 0x1d6   :  { %v1012_v54 = vmul.f32 %v2773_v49, %v929_v51  ;;  %v2548_v49 = vor.u32 %v2726_v46, %v2547_v41  ;;  %v2725_v51 = vld [vmem:[#allocation10 + $0x64] sm:$0xf]  ;;  %v2716_v41 = vld [vmem:[#allocation10 + $0x14] sm:$0xf0] }
 0x1d7   :  { %v1002_v44 = vsel %vm1001_vm15, %v3250_v50, %v998_v61  ;;  %v3289_v34 = vpop.f32.mrf.mxu1  ;;  %v2552_v55 = vor.u32 %v2725_v51, %v2549_v52  ;;  %v2540_v61 = vor.u32 %v2724_v40, %v2539_v10  ;;  %v2715_v40 = vld [vmem:[#allocation10 + $0x14] sm:$0xf] }
 0x1d8   :  { %v1014_v57 = vadd.f32 %v1012_v54, %v1010_v53  ;;  %v2775_v62 = vpop.eup %2774  ;;  %v1007_v1 = vsel %vm1004_vm0, %v1006_v60, %v1002_v44  ;;  %1783 = vmatpush.bf16.msra.mxu3 %v2548_v49 }
 0x1d9   :  { %v1017_v63 = vmul.f32 %v2775_v62, %v992_v5  ;;  %v2722_v62 = vld [vmem:[#allocation10 + $0x44] sm:$0xf0]  ;;  %1797 = vmatpush.bf16.msrb.mxu0 %v2552_v55 }
 0x1da   :  { %2776 = vtanh.f32 %v1014_v57  ;;  %1023 = vst [vmem:[#allocation14 + $0x8] sm:$0xff] %v1014_v57  ;;  %v2723_v57 = vld [vmem:[#allocation10 + $0x54] sm:$0xf] }
 0x1db   :  { %1020 = vst [vmem:[#allocation12] sm:$0xff] %v1017_v63  ;;  %v2544_v44 = vor.u32 %v2723_v57, %v2541_v58  ;;  %v2499_v57 = vld [vmem:[#allocation10] sm:$0xf]  ;;  %v2714_v58 = vld [vmem:[#allocation10 + $0x4] sm:$0xf0] }
 0x1dc   :  { %1784 = vmatpush.bf16.msra.mxu3 %v2540_v61 }
 0x1dd   :  { %1798 = vmatpush.bf16.msrb.mxu0 %v2544_v44 }
 0x1e0   :  { %v2777_v0 = vpop.eup %2776 }
 0x1e1   :  { %v1018_v3 = vmul.f32 %v2777_v0, %v1007_v1  ;;  %v1533_v1 = vperm.slane %v3286_v14, 2 }
 0x1e3   :  { %v1019_v4 = vpack.c.bf16 %v1018_v3, %v1017_v63  ;;  %1021 = vst [vmem:[#allocation12 + $0x8] sm:$0xff] %v1018_v3 }
 0x1e5   :  { %1480 = vmatmul.bf16.vlgmr.msrb.gmra.mxu3 %v1019_v4  ;;  %1494 = vmatmul.bf16.vlgmr.msra.gmra.mxu0 %v1019_v4 }
 0x1e6   :  { %1508 = vmatmul.bf16.vlgmr.msra.gmra.mxu1 %v1019_v4  ;;  %1522 = vmatmul.bf16.vlgmr.msra.gmra.mxu2 %v1019_v4  ;;  %v2721_v4 = vld [vmem:[#allocation10 + $0x44] sm:$0xf] }
 0x262   :  { %v1495_v33 = vpop.f32.mrf.mxu0 }
 0x263   :  { %v1496_v18 = vadd.f32 %v1495_v33, %v1279_v6  ;;  %v1509_v32 = vpop.f32.mrf.mxu1  ;;  %v2533_v6 = vld [vmem:[#allocation10 + $0x48] sm:$0xf0]  ;;  %v2523_v33 = vld [vmem:[#allocation10 + $0x30] sm:$0xf] }
 0x264   :  { %v1510_v0 = vadd.f32 %v1509_v32, %v3281_v56  ;;  %v2720_v56 = vld [vmem:[#allocation10 + $0x34] sm:$0xf0]  ;;  %v2517_v32 = vld [vmem:[#allocation10 + $0x28] sm:$0xf0] }
 0x265   :  { %v1540_v20 = vadd.f32 %v1532_v17, %v1496_v18  ;;  %v2520_v51 = vor.u32 %v2717_v31, %v2517_v32 }
 0x267   :  { %v2493_v2 = vmul.f32 -1.442695, %v1540_v20  ;;  %v2536_v20 = vor.u32 %v2721_v4, %v2533_v6  ;;  %v2500_v6 = vor.u32 %v2714_v58, %v2499_v57 }
 0x268   :  { %v1481_v37 = vpop.f32.mrf.mxu3 }
 0x269   :  { %2778 = vpow2.f32 %v2493_v2  ;;  %v1482_v23 = vadd.f32 %v1481_v37, %v1265_v9  ;;  %v1523_v50 = vpop.f32.mrf.mxu2  ;;  %v1541_v2 = vadd.f32 %v1533_v1, %v1510_v0  ;;  %v2719_v37 = vld [vmem:[#allocation10 + $0x34] sm:$0xf]  ;;  %1799 = vmatpush.bf16.msrb.mxu0 %v2536_v20 }
 0x26a   :  { %v1524_v24 = vadd.f32 %v1523_v50, %v1307_v7  ;;  %v1497_v25 = vpop.f32.mrf.mxu0  ;;  %v2524_v50 = vor.u32 %v2720_v56, %v2523_v33 }
 0x26b   :  { %v1539_v26 = vadd.f32 %v1531_v21, %v1482_v23  ;;  %v1498_v27 = vadd.f32 %v1497_v25, %v1281_v13  ;;  %v1511_v13 = vpop.f32.mrf.mxu1  ;;  %v2718_v25 = vld [vmem:[#allocation10 + $0x24] sm:$0xf0] }
 0x26c   :  { %v1542_v28 = vadd.f32 %v1534_v22, %v1524_v24  ;;  %v2515_v24 = vld [vmem:[#allocation10 + $0x20] sm:$0xf] }
 0x26d   :  { %v2491_v11 = vmul.f32 -1.442695, %v1539_v26  ;;  %v1544_v35 = vadd.f32 %v1532_v17, %v1498_v27 }
 0x26e   :  { %v2495_v38 = vmul.f32 -1.442695, %v1542_v28 }
 0x26f   :  { %v2779_v19 = vpop.eup %2778  ;;  %2780 = vpow2.f32 %v2491_v11  ;;  %v2494_v42 = vmul.f32 -1.442695, %v1544_v35 }
 0x270   :  { %v3293_v43 = vadd.f32 1.0, %v2779_v19  ;;  %2782 = vpow2.f32 %v2495_v38  ;;  %v1483_v45 = vpop.f32.mrf.mxu3  ;;  %v2516_v38 = vor.u32 %v2718_v25, %v2515_v24 }
 0x271   :  { %2784 = vpow2.f32 %v2494_v42  ;;  %v1484_v47 = vadd.f32 %v1483_v45, %v1267_v15  ;;  %v1525_v48 = vpop.f32.mrf.mxu2  ;;  %v2532_v15 = vor.u32 %v2722_v62, %v2531_v12  ;;  %v2507_v45 = vld [vmem:[#allocation10 + $0x10] sm:$0xf] }
 0x272   :  { %2786 = vrcp.f32 %v3293_v43  ;;  %v1526_v54 = vadd.f32 %v1525_v48, %v1309_v59  ;;  %v1602_v35 = vand.u32 2147483647, %v3293_v43  ;;  %v1604_v16 = vand.u32 2147483648, %v3293_v43 }
 0x273   :  { %v1543_v53 = vadd.f32 %v1531_v21, %v1484_v47  ;;  %v1512_v21 = vadd.f32 %v1511_v13, %v3289_v34  ;;  %1785 = vmatpush.bf16.msra.mxu3 %v2532_v15  ;;  %vm1598_vm2 = vweird.f32 %v3293_v43  ;;  %v2501_v13 = vld [vmem:[#allocation10 + $0x8] sm:$0xf0] }
 0x274   :  { %v1546_v63 = vadd.f32 %v1534_v22, %v1526_v54  ;;  %v2525_v22 = vld [vmem:[#allocation10 + $0x38] sm:$0xf0]  ;;  %vm3349_vm5 = vcmp.eq.f32.partialorder %v1602_v35, 8.507059e+37 }
 0x275   :  { %v2781_v5 = vpop.eup %2780  ;;  %v2492_v8 = vmul.f32 -1.442695, %v1543_v53  ;;  %v2528_v28 = vor.u32 %v2719_v37, %v2525_v22  ;;  %v1545_v30 = vadd.f32 %v1533_v1, %v1512_v21  ;;  %v2509_v53 = vld [vmem:[#allocation10 + $0x18] sm:$0xf0] }
 0x276   :  { %v2783_v60 = vpop.eup %2782  ;;  %v3298_v3 = vadd.f32 1.0, %v2781_v5  ;;  %v2496_v59 = vmul.f32 -1.442695, %v1546_v63  ;;  %v1605_v5 = vor.u32 1.1754944e-38, %v1604_v16 }
 0x277   :  { %v2785_v7 = vpop.eup %2784  ;;  %v3300_v9 = vadd.f32 1.0, %v2783_v60  ;;  %2788 = vpow2.f32 %v2492_v8  ;;  %1786 = vmatpush.bf16.msra.mxu3 %v2524_v50  ;;  %1800 = vmatpush.bf16.msrb.mxu0 %v2528_v28  ;;  %v2512_v60 = vor.u32 %v2715_v40, %v2509_v53 }
 0x278   :  { %v3302_v17 = vpop.eup %2786  ;;  %2790 = vrcp.f32 %v3298_v3  ;;  %v3308_v18 = vadd.f32 1.0, %v2785_v7  ;;  %v1564_v42 = vand.u32 2147483647, %v3298_v3  ;;  %v1566_v52 = vand.u32 2147483648, %v3298_v3  ;;  %v2713_v7 = vld [vmem:[#allocation10 + $0x4] sm:$0xf] }
 0x279   :  { %v1594_v14 = vmul.f32 %v3302_v17, %v3293_v43  ;;  %2792 = vrcp.f32 %v3300_v9  ;;  %vm1599_vm1 = vweird.f32 %v3302_v17  ;;  %v2508_v43 = vor.u32 %v2716_v41, %v2507_v45 }
 0x27a   :  { %2794 = vpow2.f32 %v2496_v59  ;;  %vm3339_vm3 = vmor %vm1598_vm2, %vm1599_vm1  ;;  %vm1560_vm6 = vweird.f32 %v3298_v3  ;;  %vm1565_vm8 = vcmp.eq.f32.partialorder %v1564_v42, 8.507059e+37  ;;  %v1567_v1 = vor.u32 1.1754944e-38, %v1566_v52 }
 0x27b   :  { %v1595_v23 = vsub.f32 1.0, %v1594_v14  ;;  %2796 = vrcp.f32 %v3308_v18  ;;  %1787 = vmatpush.bf16.msra.mxu3 %v2516_v38  ;;  %1801 = vmatpush.bf16.msrb.mxu0 %v2520_v51  ;;  %v1617_v20 = vand.u32 2147483647, %v3308_v18  ;;  %vm1613_vm10 = vweird.f32 %v3308_v18 }
 0x27c   :  { %2798 = vtanh.f32 %v1541_v2  ;;  %v1619_v2 = vand.u32 2147483648, %v3308_v18  ;;  %v2504_v22 = vor.u32 %v2713_v7, %v2501_v13  ;;  %vm1638_vm2 = vweird.f32 %v3300_v9 }
 0x27d   :  { %v2789_v26 = vpop.eup %2788  ;;  %v1596_v27 = vmul.f32 %v3302_v17, %v1595_v23  ;;  %vm1618_vm13 = vcmp.eq.f32.partialorder %v1617_v20, 8.507059e+37  ;;  %v1642_v45 = vand.u32 2147483647, %v3300_v9 }
 0x27e   :  { %v3313_v29 = vpop.eup %2790  ;;  %v3315_v34 = vadd.f32 1.0, %v2789_v26 }
 0x27f   :  { %v3317_v11 = vpop.eup %2792  ;;  %v1556_v36 = vmul.f32 %v3313_v29, %v3298_v3  ;;  %v1597_v19 = vadd.f32 %v3302_v17, %v1596_v27  ;;  %vm1561_vm4 = vweird.f32 %v3313_v29  ;;  %1788 = vmatpush.bf16.msra.mxu3 %v2508_v43  ;;  %1802 = vmatpush.bf16.msrb.mxu0 %v2512_v60 }
 0x280   :  { %v2795_v39 = vpop.eup %2794  ;;  %2800 = vrcp.f32 %v3315_v34  ;;  %v1634_v48 = vmul.f32 %v3317_v11, %v3300_v9  ;;  %vm1562_vm7 = vmor %vm1560_vm6, %vm1561_vm4  ;;  %v1581_v24 = vand.u32 2147483648, %v3315_v34  ;;  %vm1575_vm14 = vweird.f32 %v3315_v34 }
 0x281   :  { %v3327_v46 = vpop.eup %2796  ;;  %v1557_v47 = vsub.f32 1.0, %v1556_v36  ;;  %v3331_v49 = vadd.f32 1.0, %v2795_v39  ;;  %2802 = vtanh.f32 %v1545_v30  ;;  %v1601_v12 = vsel %vm3339_vm3, %v3302_v17, %v1597_v19  ;;  %v1028_v17 = vld [vmem:[#allocation7 + $0x10] sm:$0xff]  ;;  %v1029_v39 = vld [vmem:[#allocation7 + $0x18] sm:$0xff] }
 0x282   :  { %v1609_v10 = vmul.f32 %v3327_v46, %v3308_v18  ;;  %v2799_v61 = vpop.eup %2798  ;;  %v1635_v44 = vsub.f32 1.0, %v1634_v48  ;;  %v1606_v59 = vsel %vm3349_vm5, %v1605_v5, %v1601_v12  ;;  %vm1614_vm9 = vweird.f32 %v3327_v46 }
 0x283   :  { %v1558_v55 = vmul.f32 %v3313_v29, %v1557_v47  ;;  %2804 = vrcp.f32 %v3331_v49  ;;  %vm3372_vm11 = vmor %vm1613_vm10, %vm1614_vm9  ;;  %v1663_v26 = vmul.f32 %v1606_v59, %v1028_v17  ;;  %1789 = vmatpush.bf16.msra.mxu3 %v2500_v6  ;;  %v1620_v30 = vor.u32 1.1754944e-38, %v1619_v2  ;;  %1803 = vmatpush.bf16.msrb.mxu0 %v2504_v22 }
 0x284   :  { %v1610_v8 = vsub.f32 1.0, %v1609_v10  ;;  %v1636_v23 = vmul.f32 %v3317_v11, %v1635_v44  ;;  %vm1639_vm15 = vweird.f32 %v3317_v11  ;;  %v1582_v38 = vor.u32 1.1754944e-38, %v1581_v24 }
 0x285   :  { %v1559_v63 = vadd.f32 %v3313_v29, %v1558_v55  ;;  %v1644_v19 = vand.u32 2147483648, %v3300_v9  ;;  %vm1640_vm3 = vmor %vm1638_vm2, %vm1639_vm15  ;;  %vm1643_vm4 = vcmp.eq.f32.partialorder %v1642_v45, 8.507059e+37  ;;  %v1659_v54 = vand.u32 2147483648, %v3331_v49 }
 0x286   :  { %v2801_v0 = vpop.eup %2800  ;;  %v1611_v4 = vmul.f32 %v3327_v46, %v1610_v8  ;;  %v1637_v16 = vadd.f32 %v3317_v11, %v1636_v23  ;;  %vm1653_vm6 = vweird.f32 %v3331_v49 }
 0x287   :  { %v1563_v15 = vsel %vm1562_vm7, %v3313_v29, %v1559_v63  ;;  %v1571_v3 = vmul.f32 %v2801_v0, %v3315_v34  ;;  %v2803_v33 = vpop.eup %2802  ;;  %vm1576_vm12 = vweird.f32 %v2801_v0  ;;  %v1579_v29 = vand.u32 2147483647, %v3315_v34 }
 0x288   :  { %v1568_v56 = vsel %vm1565_vm8, %v1567_v1, %v1563_v15  ;;  %v1612_v14 = vadd.f32 %v3327_v46, %v1611_v4  ;;  %vm1577_vm0 = vmor %vm1575_vm14, %vm1576_vm12  ;;  %v1645_v51 = vor.u32 1.1754944e-38, %v1644_v19  ;;  %v1660_v43 = vor.u32 1.1754944e-38, %v1659_v54 }
 0x289   :  { %v3366_v21 = vpop.eup %2804  ;;  %v1572_v37 = vsub.f32 1.0, %v1571_v3  ;;  %v1665_v27 = vmul.f32 %v2799_v61, %v1568_v56  ;;  %vm1580_vm1 = vcmp.eq.f32.partialorder %v1579_v29, 8.507059e+37 }
 0x28a   :  { %v1649_v25 = vmul.f32 %v3366_v21, %v3331_v49  ;;  %v1616_v18 = vsel %vm3372_vm11, %v3327_v46, %v1612_v14  ;;  %v1641_v46 = vsel %vm1640_vm3, %v3317_v11, %v1637_v16  ;;  %vm1654_vm5 = vweird.f32 %v3366_v21 }
 0x28b   :  { %v1573_v28 = vmul.f32 %v2801_v0, %v1572_v37  ;;  %v1667_v32 = vadd.f32 %v1665_v27, %v1663_v26  ;;  %v1621_v36 = vsel %vm1618_vm13, %v1620_v30, %v1616_v18  ;;  %v1646_v40 = vsel %vm1643_vm4, %v1645_v51, %v1641_v46  ;;  %vm1655_vm7 = vmor %vm1653_vm6, %vm1654_vm5 }
 0x28c   :  { %v1650_v31 = vsub.f32 1.0, %v1649_v25  ;;  %v1664_v47 = vmul.f32 %v1621_v36, %v1029_v39  ;;  %v1657_v11 = vand.u32 2147483647, %v3331_v49  ;;  %v1696_v49 = vld [vmem:[%s3425_s7] sm:$0x3] }
 0x28d   :  { %v1574_v35 = vadd.f32 %v2801_v0, %v1573_v28  ;;  %2806 = vtanh.f32 %v1667_v32  ;;  %1678 = vst [vmem:[#allocation14 + $0x10] sm:$0xff] %v1667_v32  ;;  %v1699_v62 = vperm.slane %v1696_v49, 1  ;;  %v1698_v63 = vperm.slane %v1696_v49, 0 }
 0x28e   :  { %v1651_v41 = vmul.f32 %v3366_v21, %v1650_v31  ;;  %vm1658_vm8 = vcmp.eq.f32.partialorder %v1657_v11, 8.507059e+37 }
 0x28f   :  { %v1578_v42 = vsel %vm1577_vm0, %v2801_v0, %v1574_v35 }
 0x290   :  { %v1583_v34 = vsel %vm1580_vm1, %v1582_v38, %v1578_v42  ;;  %v1652_v53 = vadd.f32 %v3366_v21, %v1651_v41 }
 0x291   :  { %v1666_v48 = vmul.f32 %v2803_v33, %v1583_v34 }
 0x292   :  { %v1656_v55 = vsel %vm1655_vm7, %v3366_v21, %v1652_v53 }
 0x293   :  { %v1668_v52 = vadd.f32 %v1666_v48, %v1664_v47  ;;  %v2807_v10 = vpop.eup %2806  ;;  %v1661_v58 = vsel %vm1658_vm8, %v1660_v43, %v1656_v55 }
 0x294   :  { %v1671_v9 = vmul.f32 %v2807_v10, %v1646_v40 }
 0x295   :  { %2808 = vtanh.f32 %v1668_v52  ;;  %1679 = vst [vmem:[#allocation14 + $0x18] sm:$0xff] %v1668_v52 }
 0x296   :  { %1675 = vst [vmem:[#allocation12 + $0x10] sm:$0xff] %v1671_v9 }
 0x29b   :  { %v2809_v57 = vpop.eup %2808 }
 0x29c   :  { %v1672_v61 = vmul.f32 %v2809_v57, %v1661_v58 }
 0x29e   :  { %v1673_v12 = vpack.c.bf16 %v1672_v61, %v1671_v9  ;;  %1676 = vst [vmem:[#allocation12 + $0x18] sm:$0xff] %v1672_v61 }
 0x29f   :  { %1839 = dma.vmem_to_hbm [thread:$0]  %s1832_s11, 512, %s1834_s29, [#allocation13], %s3013_s21, %s3013_s21, %s3014_s22  }
 0x2a0   :  { %1790 = vmatmul.bf16.vlgmr.msra.gmra.mxu3 %v1673_v12  ;;  %1804 = vmatmul.bf16.vlgmr.msrb.gmra.mxu0 %v1673_v12  ;;  %1852 = dma.vmem_to_hbm [thread:$0]  %s1845_s16, 512, %s1847_s14, [#allocation13], %s3013_s21, %s3013_s21, %s3014_s22  }
 0x2a1   :  { %s1820_s21 = sshll.u32 %s3426_s8, 4  ;;  %s1821_s21 = int_to_ptr.hbm [resolvable:$true] %s1820_s21 }
 0x31d   :  { %v1805_v5 = vpop.f32.mrf.mxu0 }
 0x31e   :  { %v1806_v8 = vadd.f32 %v1805_v5, %v1699_v62 }
 0x320   :  { %1811 = vst [vmem:[#allocation11 + $0x8] sm:$0xff] %v1806_v8 }
 0x323   :  { %v1791_v44 = vpop.f32.mrf.mxu3 }
 0x324   :  { %v1792_v60 = vadd.f32 %v1791_v44, %v1698_v63 }
 0x325   :  { %v1807_v0 = vpop.f32.mrf.mxu0 }
 0x326   :  { %1810 = vst [vmem:[#allocation11] sm:$0xff] %v1792_v60  ;;  %v1808_v1 = vadd.f32 %v1807_v0, %v1699_v62 }
 0x328   :  { %1813 = vst [vmem:[#allocation11 + $0x18] sm:$0xff] %v1808_v1 }
 0x32b   :  { %v1793_v4 = vpop.f32.mrf.mxu3 }
 0x32c   :  { %v1794_v6 = vadd.f32 %v1793_v4, %v1698_v63 }
 0x32e   :  { %1812 = vst [vmem:[#allocation11 + $0x10] sm:$0xff] %v1794_v6 }
 0x32f   :  { %1826 = dma.vmem_to_hbm [thread:$0]  %s1819_s18, 512, %s1821_s21, [#allocation4], %s3016_s2, %s3016_s2, %s3017_s25  }
 0x330   :  { %3008 = dma.done.wait [#allocation4], 512  }
 0x331   :  { %3009 = vsyncadd [#allocation4], 4294966784 }
 0x332   :  { %3010 = dma.done.wait [#allocation13], 1024  }
 0x333   :  { %3011 = vsyncadd [#allocation13], 4294966272 }
 0x334   :  { %1865 = vsyncpa [#allocation3], 1 }
 0x335   :  { %1866 = vsyncpa [#allocation6], 1 }
 0x336   :  { %1867 = vsyncpa [#allocation9], 1 }
 0x337   :  { %1868 = vsyncpa [#allocation4], 1 }
 0x338   :  { %1869 = vsyncpa [#allocation13], 1 }

</bundles_post_ra>
